<compile_context>
chip_gen: v7x
topology: tpu7x:2x2x1
jax: 0.10.0
libtpu: 0.0.40
codegen_flags: <defaults>
</compile_context>

<pallas_src>
import functools

import jax
import jax.numpy as jnp
from jax.experimental import pallas as pl
from jax.experimental.pallas import tpu as pltpu


def _self_attn_kernel(gamma_ref,          # SMEM (1,) f32
                      x_ref,              # (1, C, N)   full x, compute_dtype
                      w_ref,              # (Co_all, C) fused Wq|Wk|Wv, compute_dtype
                      b_ref,              # (Co_all, 1) fused bias, f32
                      o_ref,              # (1, C, TQ)  output tile, f32
                      qkv_ref,            # VMEM scratch (Co_all, N), compute_dtype
                      *, cq_pad, tq, compute_dtype):
    j = pl.program_id(1)

    # One fused projection GEMM per batch element (1x1 convs == channel
    # matmuls); result cached in VMEM scratch across all query tiles.
    @pl.when(j == 0)
    def _():
        qkv = jnp.dot(w_ref[...], x_ref[0],
                      preferred_element_type=jnp.float32) + b_ref[...]
        qkv_ref[...] = qkv.astype(qkv_ref.dtype)

    start = pl.multiple_of(j * tq, tq)
    q = qkv_ref[0:cq_pad, pl.ds(start, tq)]             # (Cq_pad, TQ)
    k = qkv_ref[cq_pad:2 * cq_pad, :]                   # (Cq_pad, N)
    v = qkv_ref[2 * cq_pad:, :]                         # (C, N)
    xq = x_ref[0, :, pl.ds(start, tq)]                  # (C, TQ) residual source

    # energy[j_key, i_query] = k[:, j] . q[:, i]  (keys on sublanes, queries
    # on lanes); contraction expressed via dimension_numbers, no transpose.
    energy = jax.lax.dot_general(
        k, q, dimension_numbers=(((0,), (0,)), ((), ())),
        preferred_element_type=jnp.float32)              # (N, TQ) f32

    # Numerically stable softmax over keys (axis 0), normalization deferred.
    m = jnp.max(energy, axis=0, keepdims=True)           # (1, TQ) f32
    if compute_dtype == jnp.float32:
        p = jnp.exp(energy - m)                           # exact path
        l = jnp.sum(p, axis=0, keepdims=True)
        inv_l = 1.0 / l
    else:
        # bf16 exponent (bf16 EUP on v6e/v7x) feeds the MXU with no extra cast.
        # TODO(synk): keep the f32 exp on v5e (no bf16 EUP/VPU there).
        p = jnp.exp((energy - m).astype(compute_dtype))   # (N, TQ) bf16
        l = jnp.sum(p, axis=0, keepdims=True, dtype=jnp.float32)
        inv_l = pl.reciprocal(l, approx=True)             # EUP slot, ~2^-12 rel err

    # out[c, i] = sum_j v[c, j] * p[j, i] / l[i]; residual added in f32.
    ctx = jnp.dot(v, p, preferred_element_type=jnp.float32)        # (C, TQ)
    gamma = gamma_ref[0]
    o_ref[0] = (gamma * (ctx * inv_l) + xq).astype(o_ref.dtype)    # lane-dense store


def _pack_params(params, compute_dtype):
    """Zero-pad Cq to the bf16 packed-sublane tile (16) and fuse Wq|Wk|Wv into
    one projection matrix.  Zero rows / zero bias contribute nothing: exact."""
    cq = params["wq"].shape[0]
    cq_pad = max(16, ((cq + 15) // 16) * 16)

    def pad_rows(a, rows):
        return jnp.pad(a, ((0, rows - a.shape[0]),) + ((0, 0),) * (a.ndim - 1))

    w_all = jnp.concatenate([pad_rows(params["wq"], cq_pad),
                             pad_rows(params["wk"], cq_pad),
                             params["wv"]], axis=0).astype(compute_dtype)
    b_all = jnp.concatenate([pad_rows(params["bq"][:, None], cq_pad),
                             pad_rows(params["bk"][:, None], cq_pad),
                             params["bv"][:, None]], axis=0).astype(jnp.float32)
    return w_all, b_all, cq_pad


def _pick_tq(n, tq):
    # Default query tile 256: bounds the (N, TQ) score tile for v7x's 64 MiB
    # VMEM; on the 128 MiB parts (v5e/v6e) tq=512 is also a good choice.
    if tq is None:
        tq = 256
    tq = min(tq, n)
    if n % tq != 0 or (tq < n and tq % 128 != 0):
        # TODO(synk): for large N that is not a multiple of 128, pad/mask the
        # key axis instead of de-tiling (an (N, N) score tile can blow VMEM).
        tq = n
    return tq


def self_attention_pallas(x_nchw, params, *, tq=None, compute_dtype=jnp.bfloat16):
    """x_nchw: (B, C, H, W) float32.  params: raw PyTorch-style weights."""
    B, C, H, W = x_nchw.shape
    N = H * W
    # Free reshape + single wrapper-side cast (bf16 halves x HBM traffic).
    x_bcn = x_nchw.reshape(B, C, N).astype(compute_dtype)

    w_all, b_all, cq_pad = _pack_params(params, compute_dtype)
    co_all = w_all.shape[0]
    tq = _pick_tq(N, tq)
    n_q = N // tq

    kernel = functools.partial(_self_attn_kernel, cq_pad=cq_pad, tq=tq,
                               compute_dtype=compute_dtype)

    xbytes = jnp.dtype(compute_dtype).itemsize
    # Resident-set estimate: double-buffered full-x block + qkv cache + f32
    # score/p intermediates + double-buffered output + weights + headroom.
    vmem_est = (2 * C * N * xbytes + co_all * N * xbytes
                + 2 * N * tq * 4 + 2 * C * tq * 4
                + co_all * (C * xbytes + 4) + (2 << 20))
    vmem_limit = int(min(max(vmem_est, 32 << 20), 100 << 20))

    cost = pl.CostEstimate(
        flops=int(2 * B * (co_all * C * N + cq_pad * N * N + C * N * N)),
        transcendentals=int(B * N * N),
        bytes_accessed=int(B * C * N * (xbytes + 4) + co_all * (C * xbytes + 4)),
    )

    full2d = lambda shape: pl.BlockSpec(shape, lambda b, j: (0, 0))

    out_bcn = pl.pallas_call(
        kernel,
        out_shape=jax.ShapeDtypeStruct((B, C, N), x_nchw.dtype),
        grid_spec=pltpu.PrefetchScalarGridSpec(
            num_scalar_prefetch=0,
            grid=(B, n_q),
            in_specs=[
                pl.BlockSpec(memory_space=pltpu.MemorySpace.SMEM),   # gamma
                pl.BlockSpec((1, C, N), lambda b, j: (b, 0, 0)),     # full x, once per b
                full2d((co_all, C)),                                 # fused Wq|Wk|Wv
                full2d((co_all, 1)),                                 # fused bias (f32)
            ],
            out_specs=pl.BlockSpec((1, C, tq), lambda b, j: (b, 0, j)),
            scratch_shapes=[pltpu.VMEM((co_all, N), compute_dtype)], # per-batch qkv cache
        ),
        compiler_params=pltpu.CompilerParams(
            # batch axis parallel (v7x megacore splits over B); query axis must
            # be sequential ("arbitrary") so the per-batch qkv cache is legal.
            dimension_semantics=("parallel", "arbitrary"),
            vmem_limit_bytes=vmem_limit,
        ),
        cost_estimate=cost,
    )(params["gamma"], x_bcn, w_all, b_all)

    return out_bcn.reshape(B, C, H, W)


def self_attention_ref(x_nchw, params):
    """Pure-JAX reference mirroring the PyTorch forward exactly (f32)."""
    B, C, H, W = x_nchw.shape
    N = H * W
    x_flat = x_nchw.reshape(B, C, N)                                  # (B, C, N)

    def conv1x1(w, b):  # w: (Co, C), b: (Co,)
        return jnp.einsum("oc,bcn->bon", w, x_flat) + b[None, :, None]

    q = conv1x1(params["wq"], params["bq"])                           # (B, Cq, N)
    k = conv1x1(params["wk"], params["bk"])                           # (B, Cq, N)
    v = conv1x1(params["wv"], params["bv"])                           # (B, C, N)
    energy = jnp.einsum("bci,bcj->bij", q, k)                         # (B, N, N)
    attn = jax.nn.softmax(energy, axis=-1)
    out = jnp.einsum("bcj,bij->bci", v, attn)                         # (B, C, N)
    return params["gamma"][0] * out.reshape(B, C, H, W) + x_nchw


def init_params(key, C):
    Cq = max(1, C // 8)
    ks = jax.random.split(key, 6)
    # PyTorch conv weight layout (out_ch, in_ch); biases 1-D.
    return {
        "wq": 0.1 * jax.random.normal(ks[0], (Cq, C), jnp.float32),
        "bq": 0.1 * jax.random.normal(ks[1], (Cq,), jnp.float32),
        "wk": 0.1 * jax.random.normal(ks[2], (Cq, C), jnp.float32),
        "bk": 0.1 * jax.random.normal(ks[3], (Cq,), jnp.float32),
        "wv": 0.1 * jax.random.normal(ks[4], (C, C), jnp.float32),
        "bv": 0.1 * jax.random.normal(ks[5], (C,), jnp.float32),
        "gamma": jnp.zeros((1,), jnp.float32),   # nn.Parameter(torch.zeros(1))
    }


if __name__ == "__main__":
    key = jax.random.PRNGKey(0)
    kx, kp = jax.random.split(key)

    B, C, H, W = 2, 32, 16, 16          # Cq = 4 (padded to 16), N = 256
    x = jax.random.normal(kx, (B, C, H, W), jnp.float32)
    params = init_params(kp, C)

    # Module init (gamma = 0): output must equal x (f32 path is exact).
    ref0 = self_attention_ref(x, params)
    out0 = jax.block_until_ready(
        self_attention_pallas(x, params, compute_dtype=jnp.float32))
    assert jnp.allclose(out0, ref0, atol=1e-5, rtol=1e-5)

    # Full attention path with nonzero gamma.
    params_g = dict(params, gamma=jnp.full((1,), 0.5, jnp.float32))
    ref1 = self_attention_ref(x, params_g)

    # f32 MXU path with query tiling (two TQ=128 tiles -> exercises the
    # per-batch qkv VMEM cache and the pl.when init) -- tight check.
    out1 = jax.block_until_ready(
        self_attention_pallas(x, params_g, tq=128, compute_dtype=jnp.float32))
    assert jnp.allclose(out1, ref1, atol=1e-4, rtol=1e-4)

    # Default bf16 MXU path (single TQ=256 tile) -- loose check.
    out2 = jax.block_until_ready(self_attention_pallas(x, params_g))
    assert jnp.allclose(out2, ref1, atol=3e-2, rtol=3e-2)

    # bf16 path with query tiling (cache + bf16 exp exercised together).
    out3 = jax.block_until_ready(self_attention_pallas(x, params_g, tq=128))
    assert jnp.allclose(out3, ref1, atol=3e-2, rtol=3e-2)

    print("KERNEL_OK")
</pallas_src>

<mosaic_0001>
module attributes {stable_mosaic.version = 11 : i64} {
  func.func @_self_attn_kernel(%arg0: i32, %arg1: i32, %arg2: memref<1xf32, #tpu.memory_space<smem>>, %arg3: memref<1x32x256xf32, #tpu.memory_space<vmem>>, %arg4: memref<64x32xf32, #tpu.memory_space<vmem>>, %arg5: memref<64x1xf32, #tpu.memory_space<vmem>>, %arg6: memref<1x32x256xf32, #tpu.memory_space<vmem>>, %arg7: memref<64x256xf32, #tpu.memory_space<vmem>>) attributes {dimension_semantics = [#tpu.dimension_semantics<parallel>, #tpu.dimension_semantics<arbitrary>], iteration_bounds = array<i64: 2, 1>, scalar_prefetch = 0 : i64, scratch_operands = 1 : i64, tpu.core_type = #tpu.core_type<tc>, window_params = [{transform_indices = @transform_0, window_bounds = array<i64: 1>}, {transform_indices = @transform_1, window_bounds = array<i64: 1, 32, 256>}, {pipeline_mode = #tpu.pipeline_mode<synchronous>, transform_indices = @transform_2, window_bounds = array<i64: 64, 32>}, {pipeline_mode = #tpu.pipeline_mode<synchronous>, transform_indices = @transform_3, window_bounds = array<i64: 64, 1>}, {transform_indices = @transform_4, window_bounds = array<i64: 1, 32, 256>}]} {
    %c0_i32 = arith.constant 0 : i32
    %0 = arith.cmpi eq, %arg1, %c0_i32 : i32
    %1 = arith.extui %0 : i1 to i32
    %c0_i32_0 = arith.constant 0 : i32
    %2 = arith.cmpi ne, %1, %c0_i32_0 : i32
    scf.if %2 {
      %c0_13 = arith.constant 0 : index
      %c0_14 = arith.constant 0 : index
      %32 = vector.load %arg4[%c0_13, %c0_14] : memref<64x32xf32, #tpu.memory_space<vmem>>, vector<64x32xf32>
      %c0_15 = arith.constant 0 : index
      %c0_16 = arith.constant 0 : index
      %c0_17 = arith.constant 0 : index
      %33 = vector.load %arg3[%c0_15, %c0_16, %c0_17] : memref<1x32x256xf32, #tpu.memory_space<vmem>>, vector<1x32x256xf32>
      %34 = vector.shape_cast %33 : vector<1x32x256xf32> to vector<32x256xf32>
      %cst_18 = arith.constant dense<0.000000e+00> : vector<64x256xf32>
      %35 = tpu.matmul %32, %34, %cst_18 {dimension_numbers = #tpu.dot_dimension_numbers<[1], [0], [0], [1], [0, 0, 1, 1], [], []>} : vector<64x32xf32>, vector<32x256xf32>, vector<64x256xf32> -> vector<64x256xf32>
      %c0_19 = arith.constant 0 : index
      %c0_20 = arith.constant 0 : index
      %36 = vector.load %arg5[%c0_19, %c0_20] : memref<64x1xf32, #tpu.memory_space<vmem>>, vector<64x1xf32>
      %37 = vector.broadcast %36 : vector<64x1xf32> to vector<64x256xf32>
      %38 = arith.addf %35, %37 : vector<64x256xf32>
      %c0_21 = arith.constant 0 : index
      %c0_22 = arith.constant 0 : index
      %39 = vector.load %arg7[%c0_21, %c0_22] : memref<64x256xf32, #tpu.memory_space<vmem>>, vector<64x256xf32>
      tpu.vector_store %arg7[%c0_21, %c0_22], %38 {strides = array<i32>} : memref<64x256xf32, #tpu.memory_space<vmem>>, vector<64x256xf32>,
    } else {
    }
    %c256_i32 = arith.constant 256 : i32
    %3 = arith.muli %arg1, %c256_i32 : i32
    %4 = tpu.assume_multiple %3, 256 : i32
    %c0 = arith.constant 0 : index
    %5 = arith.index_cast %4 : i32 to index
    %6 = vector.load %arg7[%c0, %5] : memref<64x256xf32, #tpu.memory_space<vmem>>, vector<16x256xf32>
    %c16 = arith.constant 16 : index
    %c0_1 = arith.constant 0 : index
    %7 = vector.load %arg7[%c16, %c0_1] : memref<64x256xf32, #tpu.memory_space<vmem>>, vector<16x256xf32>
    %c32 = arith.constant 32 : index
    %c0_2 = arith.constant 0 : index
    %8 = vector.load %arg7[%c32, %c0_2] : memref<64x256xf32, #tpu.memory_space<vmem>>, vector<32x256xf32>
    %c0_3 = arith.constant 0 : index
    %c0_4 = arith.constant 0 : index
    %9 = arith.index_cast %4 : i32 to index
    %10 = vector.load %arg3[%c0_3, %c0_4, %9] : memref<1x32x256xf32, #tpu.memory_space<vmem>>, vector<1x32x256xf32>
    %11 = vector.shape_cast %10 : vector<1x32x256xf32> to vector<32x256xf32>
    %cst = arith.constant dense<0.000000e+00> : vector<256x256xf32>
    %12 = tpu.matmul %7, %6, %cst {dimension_numbers = #tpu.dot_dimension_numbers<[0], [0], [1], [1], [0, 1, 1, 1], [], []>} : vector<16x256xf32>, vector<16x256xf32>, vector<256x256xf32> -> vector<256x256xf32>
    %cst_5 = arith.constant dense<0xFF800000> : vector<256xf32>
    %13 = vector.multi_reduction <maximumf>, %12, %cst_5 [0] : vector<256x256xf32> to vector<256xf32>
    %14 = vector.shape_cast %13 : vector<256xf32> to vector<1x256xf32>
    %15 = vector.broadcast %14 : vector<1x256xf32> to vector<256x256xf32>
    %16 = arith.subf %12, %15 : vector<256x256xf32>
    %17 = math.exp %16 : vector<256x256xf32>
    %cst_6 = arith.constant dense<0.000000e+00> : vector<256xf32>
    %18 = vector.multi_reduction <add>, %17, %cst_6 [0] : vector<256x256xf32> to vector<256xf32>
    %19 = vector.shape_cast %18 : vector<256xf32> to vector<1x256xf32>
    %cst_7 = arith.constant 1.000000e+00 : f32
    %20 = vector.broadcast %cst_7 : f32 to vector<1x256xf32>
    %21 = arith.divf %20, %19 : vector<1x256xf32>
    %cst_8 = arith.constant dense<0.000000e+00> : vector<32x256xf32>
    %22 = tpu.matmul %8, %17, %cst_8 {dimension_numbers = #tpu.dot_dimension_numbers<[1], [0], [0], [1], [0, 0, 1, 1], [], []>} : vector<32x256xf32>, vector<256x256xf32>, vector<32x256xf32> -> vector<32x256xf32>
    %c0_9 = arith.constant 0 : index
    %23 = memref.load %arg2[%c0_9] : memref<1xf32, #tpu.memory_space<smem>>
    %24 = vector.broadcast %21 : vector<1x256xf32> to vector<32x256xf32>
    %25 = arith.mulf %22, %24 : vector<32x256xf32>
    %26 = vector.broadcast %23 : f32 to vector<32x256xf32>
    %27 = arith.mulf %26, %25 : vector<32x256xf32>
    %28 = arith.addf %27, %11 : vector<32x256xf32>
    %c0_10 = arith.constant 0 : index
    %c0_11 = arith.constant 0 : index
    %c0_12 = arith.constant 0 : index
    %29 = vector.load %arg6[%c0_10, %c0_11, %c0_12] : memref<1x32x256xf32, #tpu.memory_space<vmem>>, vector<1x32x256xf32>
    %30 = vector.shape_cast %29 : vector<1x32x256xf32> to vector<32x256xf32>
    %31 = vector.shape_cast %28 : vector<32x256xf32> to vector<1x32x256xf32>
    tpu.vector_store %arg6[%c0_10, %c0_11, %c0_12], %31 {strides = array<i32>} : memref<1x32x256xf32, #tpu.memory_space<vmem>>, vector<1x32x256xf32>,
    return
  }
  func.func @transform_0(%arg0: i32, %arg1: i32) -> i32 {
    %c0_i32 = arith.constant 0 : i32
    %c0_i32_0 = arith.constant 0 : i32
    return %c0_i32 : i32
  }
  func.func @transform_1(%arg0: i32, %arg1: i32) -> (i32, i32, i32) {
    %c0_i32 = arith.constant 0 : i32
    %c0_i32_0 = arith.constant 0 : i32
    %c0_i32_1 = arith.constant 0 : i32
    return %arg0, %c0_i32, %c0_i32_0 : i32, i32, i32
  }
  func.func @transform_2(%arg0: i32, %arg1: i32) -> (i32, i32) {
    %c0_i32 = arith.constant 0 : i32
    %c0_i32_0 = arith.constant 0 : i32
    %c0_i32_1 = arith.constant 0 : i32
    return %c0_i32, %c0_i32_0 : i32, i32
  }
  func.func @transform_3(%arg0: i32, %arg1: i32) -> (i32, i32) {
    %c0_i32 = arith.constant 0 : i32
    %c0_i32_0 = arith.constant 0 : i32
    %c0_i32_1 = arith.constant 0 : i32
    return %c0_i32, %c0_i32_0 : i32, i32
  }
  func.func @transform_4(%arg0: i32, %arg1: i32) -> (i32, i32, i32) {
    %c0_i32 = arith.constant 0 : i32
    %c0_i32_0 = arith.constant 0 : i32
    return %arg0, %c0_i32, %arg1 : i32, i32, i32
  }
}

</mosaic_0001>

<bundles_post_ra>
// kernel: tpu_custom_call.1
= control target key start
LH: loop header
LB: loop body
LE: loop exit
PB: predicated region body
PF: predicated region fallthrough
CT: control target
= control target key end

     0   :  { %s2812_s0 = inlined_call_operand.<no memory space> [shape: f32[1], index: 0, kind: input, shape index: {}]   ;;  %s2813_s1 = inlined_call_operand.vmem [shape: f32[2,32,256], index: 1, kind: input, shape index: {}]   ;;  %s2814_s2 = inlined_call_operand.vmem [shape: f32[64,32], index: 2, kind: input, shape index: {}]   ;;  %s2815_s3 = inlined_call_operand.vmem [shape: f32[64,1], index: 3, kind: input, shape index: {}]   ;;  %s2816_s4 = inlined_call_operand.hbm [shape: f32[2,32,256], index: 4, kind: output, shape index: {}]  }
   0x1   :  { %9 = sst [smem:[#allocation3]] %s2812_s0 }
   0x2   :  { %10 = vsyncpa [#allocation5], 0 }
   0x3   :  { %12 = vsyncpa [#allocation5 + $0x1], 0  ;;  %s1880_s17 = smov 0   ;;  %s1882_s18 = smov 0  }
   0x4   :  { %s1884_s19 = smov 0   ;;  %s1886_s20 = smov 0  }
   0x5   :  { %s1888_s21 = smov 0   ;;  %s1890_s22 = smov 0  }
   0x6 LB: > { %s1443_s0 = sadd.s32 4294967295, %s1845_s22   ;;  %s1444_s23 = sadd.s32 4294967294, %s1845_s22   ;;  %s1845_s22 = sphi %s1890_s22, %s18_s22   ;;  %s1841_s21 = sphi %s1888_s21, %s2981_s21   ;;  %s1837_s20 = sphi %s1886_s20, %s2980_s20   ;;  %s1833_s19 = sphi %s1884_s19, %s2979_s19   ;;  %s1829_s18 = sphi %s1882_s18, %s2978_s18   ;;  %s1825_s17 = sphi %s1880_s17, %s2977_s17  }
   0x7   : > { %s30_s24 = sadd.s32 1, %s1841_s21  ;;  %s128_s25 = sadd.s32 1, %s1833_s19 }
   0x8   : > { %p32_p0 = scmp.ge.s32.totalorder %s30_s24, 2  ;;  %p138_p1 = scmp.ne.s32.totalorder %s1833_s19, %s1829_s18 }
   0x9   : > { %p139_p2 = scmp.eq.s32.totalorder %s1443_s0, 1  ;;  %p144_p3 = scmp.ne.s32.totalorder %s1829_s18, %s1825_s17 }
   0xa   : > { %s2983_s24 = smov (%p32_p0, %s30_s24), 0  ;;  %p145_p5 = scmp.eq.s32.totalorder %s1444_s23, 1 }
   0xb   : > { %p1920_p4 = por %p139_p2, %p138_p1  ;;  %s123_s27 = ssub.s32 %s1841_s21, %s2983_s24 }
   0xc   : > { %p1447_p6 = scmp.ge.s32.totalorder %s1845_s22, 1  ;;  %p126_p7 = scmp.eq.s32.totalorder %s123_s27, 0 }
   0xd   : > { %p1927_p8 = por %p145_p5, %p144_p3  ;;  %p180_p9 = scmp.lt.s32.totalorder %s1845_s22, 3 }
   0xe   : > { %s1933_s29 = scalar_select %p126_p7, %s1833_s19, %s128_s25  }
   0xf   : > { %p181_p10 = pnand %p1447_p6, %p180_p9 }
  0x11   : > { %184 = sbr.rel (%p181_p10) target bundleno = 1111 (0x457), region = 36 }
  0x18   : > { %p206_p11 = scmp.lt.s32.totalorder %s1837_s20, 1  ;;  %v1847_v0 = vmov 0.0   ;;  %v232_v1 = vld [vmem:[%s2815_s3] sm:$0xff]  ;;  %v234_v2 = vld [vmem:[%s2815_s3 + $0x10] sm:$0xff]  ;;  %v1848_v3 = vmov 0   ;;  %v233_v4 = vld [vmem:[%s2815_s3 + $0x8] sm:$0xff] }
  0x19   : > { %369 = vmatprep.mubr.f32.mxu0 %v1847_v0  ;;  %690 = vmatprep.mubr.f32.mxu1 %v1847_v0  ;;  %v235_v5 = vld [vmem:[%s2815_s3 + $0x18] sm:$0xff]  ;;  %v216_v18 = vld [vmem:[%s2814_s2] sm:$0xff]  ;;  %vm280_vm0 = vcmask 261120   ;;  %v217_v19 = vld [vmem:[%s2814_s2 + $0x8] sm:$0xff]  ;;  %vm529_vm1 = vcmask 130048   ;;  %s1497_s12 = sshll.u32 %s1837_s20, 10 }
  0x1a   : > { %s207_s8 = scalar_select %p206_p11, %s1837_s20, 1  ;;  %1634 = vset.pattern.permute.xlu1 %v1848_v3  ;;  %1633 = vset.pattern.permute.xlu0 %v1848_v3  ;;  %v218_v20 = vld [vmem:[%s2814_s2 + $0x10] sm:$0xff]  ;;  %v219_v21 = vld [vmem:[%s2814_s2 + $0x18] sm:$0xff]  ;;  %v220_v22 = vld [vmem:[%s2814_s2 + $0x20] sm:$0xff] }
  0x1b   : > { %242 = vperm.xlu1 %1634, %v232_v1   ;;  %252 = vperm.xlu0 %1633, %v234_v2   ;;  %v221_v23 = vld [vmem:[%s2814_s2 + $0x28] sm:$0xff]  ;;  %v222_v24 = vld [vmem:[%s2814_s2 + $0x30] sm:$0xff]  ;;  %v223_v25 = vld [vmem:[%s2814_s2 + $0x38] sm:$0xff]  ;;  %s2758_s0 = scalar_lea.hbm %s2816_s4, %s1497_s12  ;;  %s1849_s23 = smov [#allocation4]  }
  0x1c   : > { %s1496_s9 = sshll.u32 %s207_s8, 6  ;;  %v237_v51 = vld [vmem:[%s2815_s3 + $0x28] sm:$0xff]  ;;  %v239_v54 = vld [vmem:[%s2815_s3 + $0x38] sm:$0xff]  ;;  %v236_v58 = vld [vmem:[%s2815_s3 + $0x20] sm:$0xff]  ;;  %s1316_s8 = sld [smem:[#allocation3]] }
  0x1d   : > { %s1954_s16 = scalar_lea.vmem %s2813_s1, %s1496_s9  ;;  %v238_v59 = vld [vmem:[%s2815_s3 + $0x30] sm:$0xff]  ;;  %s203_s9 = sand.u32 1, %s1829_s18  }
  0x1e   : > { %v225_v6 = vld [vmem:[%s1954_s16 + $0x8] sm:$0xff]  ;;  %v227_v7 = vld [vmem:[%s1954_s16 + $0x18] sm:$0xff]  ;;  %v224_v8 = vld [vmem:[%s1954_s16] sm:$0xff]  ;;  %s1448_s10 = sshll.u32 %s203_s9, 6  ;;  %s2766_s20 = scalar_lea.sflag [#allocation5], %s203_s9 }
  0x1f   : > { %v1498_v9 = vpack.c.bf16 %v227_v7, %v225_v6  ;;  %v226_v10 = vld [vmem:[%s1954_s16 + $0x10] sm:$0xff]  ;;  %v229_v11 = vld [vmem:[%s1954_s16 + $0x28] sm:$0xff]  ;;  %v231_v12 = vld [vmem:[%s1954_s16 + $0x38] sm:$0xff]  ;;  %247 = vperm.xlu1 %1634, %v233_v4   ;;  %257 = vperm.xlu0 %1633, %v235_v5   ;;  %s2740_s11 = scalar_lea.vmem [#allocation4], %s1448_s10  ;;  %s1771_s25 = sshll.u32 %s1849_s23, 4  ;;  %s1772_s25 = int_to_ptr.vmem [resolvable:$false] %s1771_s25 }
  0x20   : > { %v1500_v13 = vpack.c.bf16 %v226_v10, %v224_v8  ;;  %v1502_v14 = vpack.c.bf16 %v231_v12, %v229_v11  ;;  %v228_v15 = vld [vmem:[%s1954_s16 + $0x20] sm:$0xff]  ;;  %v230_v16 = vld [vmem:[%s1954_s16 + $0x30] sm:$0xff]  ;;  %s1366_s13 = sshll.u32 %s2740_s11, 4  ;;  %s1773_s27 = scalar_lea.vmem %s1772_s25, 2048  ;;  %s2760_s13 = int_to_ptr.vmem [resolvable:$true] %s1366_s13 }
  0x21   : > { %1499 = vmatprep.subr.bf16.mxu0 %v1498_v9  ;;  %v1504_v17 = vpack.c.bf16 %v230_v16, %v228_v15  ;;  %p1774_p1 = scmp.lt.s32.totalorder %s2760_s13, %s1772_s25 }
  0x22   : > { %1501 = vmatpush1.bf16.msra.mxu0 %v1500_v13 }
  0x23   : > { %1503 = vmatprep.subr.bf16.mxu0 %v1502_v14 }
  0x26   : > { %1505 = vmatpush1.bf16.msra.mxu0 %v1504_v17 }
  0x29   : > { %1451 = vmatmul.mubr.msk.f32.vlgmr.msra.gmra.mrb[0].mxu0 %vm280_vm0, %v216_v18 }
  0x2a   : > { %375 = vmatprep.mubr.f32.mxu0 %v1847_v0 }
  0x2d   : > { %1452 = vmatmul.mubr.msk.f32.gmra.mrb[2].mxu0 %vm280_vm0, %v217_v19 }
  0x2e   : > { %381 = vmatprep.mubr.f32.mxu0 %v1847_v0 }
  0x31   : > { %1453 = vmatmul.mubr.msk.f32.gmra.mrb[4].mxu0 %vm280_vm0, %v218_v20 }
  0x32   : > { %387 = vmatprep.mubr.f32.mxu0 %v1847_v0 }
  0x35   : > { %1454 = vmatmul.mubr.msk.f32.gmra.mrb[6].mxu0 %vm280_vm0, %v219_v21 }
  0x36   : > { %393 = vmatprep.mubr.f32.mxu0 %v1847_v0 }
  0x39   : > { %1455 = vmatmul.mubr.msk.f32.gmra.mrb[8].mxu0 %vm280_vm0, %v220_v22 }
  0x3a   : > { %399 = vmatprep.mubr.f32.mxu0 %v1847_v0 }
  0x3d   : > { %1456 = vmatmul.mubr.msk.f32.gmra.mrb[10].mxu0 %vm280_vm0, %v221_v23 }
  0x3e   : > { %405 = vmatprep.mubr.f32.mxu0 %v1847_v0 }
  0x41   : > { %1457 = vmatmul.mubr.msk.f32.gmra.mrb[12].mxu0 %vm280_vm0, %v222_v24 }
  0x42   : > { %411 = vmatprep.mubr.f32.mxu0 %v1847_v0 }
  0x45   : > { %1458 = vmatmul.mubr.msk.f32.gmra.mrb[14].mxu0 %vm280_vm0, %v223_v25 }
  0x9a   : > { %v243_v26 = vpop.permute.xlu1 %242  ;;  %v253_v35 = vpop.permute.xlu0 %252 }
  0x9e   : > { %v248_v29 = vpop.permute.xlu1 %247  ;;  %v258_v43 = vpop.permute.xlu0 %257 }
  0xfc   : > { %v371_v27 = vpop.f32.mrb[0].mxu0 }
  0xfd   : > { %v373_v28 = vpop.f32.mrb[1].mxu0  ;;  %v372_v31 = vadd.f32 %v371_v27, %v243_v26 }
  0xfe   : > { %v374_v34 = vadd.f32 %v373_v28, %v243_v26 }
 0x100   : > { %v377_v30 = vpop.f32.mrb[2].mxu0 }
 0x101   : > { %v378_v32 = vadd.f32 %v377_v30, %v248_v29  ;;  %v379_v33 = vpop.f32.mrb[3].mxu0 }
 0x102   : > { %v380_v36 = vadd.f32 %v379_v33, %v248_v29 }
 0x103   : > { %v1508_v37 = vpack.c.bf16 %v378_v32, %v372_v31 }
 0x104   : > { %v383_v38 = vpop.f32.mrb[4].mxu0  ;;  %v1506_v39 = vpack.c.bf16 %v380_v36, %v374_v34 }
 0x105   : > { %v384_v40 = vadd.f32 %v383_v38, %v253_v35  ;;  %v385_v41 = vpop.f32.mrb[5].mxu0 }
 0x106   : > { %v386_v42 = vadd.f32 %v385_v41, %v253_v35  ;;  %1507 = vmatprep.subr.bf16.mxu1 %v1506_v39 }
 0x107   : > { %465 = vxpose.xlu0.b32.start [1/2] (short) %v384_v40, 128  ;;  %1509 = vmatpush1.bf16.msra.mxu1 %v1508_v37 }
 0x108   : > { %v389_v44 = vpop.f32.mrb[6].mxu0  ;;  %497 = vxpose.xlu1.b32.start [1/2] (short) %v386_v42, 128 }
 0x109   : > { %v390_v45 = vadd.f32 %v389_v44, %v258_v43  ;;  %v391_v46 = vpop.f32.mrb[7].mxu0 }
 0x10a   : > { %v392_v47 = vadd.f32 %v391_v46, %v258_v43 }
 0x10b   : > { %466 = vxpose.xlu0.b32.end [2/2] (short) %v390_v45, 128 }
 0x10c   : > { %498 = vxpose.xlu1.b32.end [2/2] (short) %v392_v47, 128  ;;  %v2003_v48 = vpop.f32.mrb[8].mxu0 }
 0x10d   : > { %v2005_v49 = vpop.f32.mrb[9].mxu0 }
 0x110   : > { %v2007_v50 = vpop.f32.mrb[10].mxu0 }
 0x111   : > { %2861 = vst [vmem:[#allocation7_spill] sm:$0xff] %v2007_v50  ;;  %v2012_v52 = vpop.f32.mrb[11].mxu0 }
 0x112   : > { %2862 = vst [vmem:[#allocation8_spill] sm:$0xff] %v2012_v52 }
 0x114   : > { %v2014_v53 = vpop.f32.mrb[12].mxu0 }
 0x115   : > { %2863 = vst [vmem:[#allocation9_spill] sm:$0xff] %v2014_v53  ;;  %v2019_v55 = vpop.f32.mrb[13].mxu0 }
 0x116   : > { %2864 = vst [vmem:[#allocation10_spill] sm:$0xff] %v2019_v55 }
 0x118   : > { %v2021_v56 = vpop.f32.mrb[14].mxu0 }
 0x119   : > { %2865 = vst [vmem:[#allocation11_spill] sm:$0xff] %v2021_v56  ;;  %v2023_v57 = vpop.f32.mrb[15].mxu0 }
 0x11a   : > { %2866 = vst [vmem:[#allocation12_spill] sm:$0xff] %v2023_v57 }
 0x162   : > { %267 = vperm.xlu1 %1634, %v237_v51  }
 0x166   : > { %277 = vperm.xlu1 %1634, %v239_v54  }
 0x16c   : > { %262 = vperm.xlu0 %1633, %v236_v58  }
 0x170   : > { %272 = vperm.xlu0 %1633, %v238_v59  }
 0x187   : > { %v481_v60 = vpop.trf.xlu0 }
 0x188   : > { %1459 = vmatmul.mubr.msk.f32.vlgmr.msra.gmra.mrb[0].mxu1 %vm529_vm1, %v481_v60  ;;  %v513_v6 = vpop.trf.xlu1 }
 0x189   : > { %696 = vmatprep.mubr.f32.mxu1 %v1847_v0 }
 0x18b   : > { %v482_v61 = vpop.trf.xlu0 }
 0x18c   : > { %1460 = vmatmul.mubr.msk.f32.gmra.mrb[2].mxu1 %vm529_vm1, %v482_v61  ;;  %v514_v8 = vpop.trf.xlu1 }
 0x18d   : > { %702 = vmatprep.mubr.f32.mxu1 %v1847_v0 }
 0x18f   : > { %v483_v62 = vpop.trf.xlu0 }
 0x190   : > { %1461 = vmatmul.mubr.msk.f32.gmra.mrb[4].mxu1 %vm529_vm1, %v483_v62  ;;  %v515_v11 = vpop.trf.xlu1 }
 0x191   : > { %708 = vmatprep.mubr.f32.mxu1 %v1847_v0 }
 0x193   : > { %v484_v63 = vpop.trf.xlu0 }
 0x194   : > { %1462 = vmatmul.mubr.msk.f32.gmra.mrb[6].mxu1 %vm529_vm1, %v484_v63  ;;  %v516_v13 = vpop.trf.xlu1 }
 0x195   : > { %714 = vmatprep.mubr.f32.mxu1 %v1847_v0 }
 0x197   : > { %v485_v1 = vpop.trf.xlu0 }
 0x198   : > { %1463 = vmatmul.mubr.msk.f32.gmra.mrb[8].mxu1 %vm529_vm1, %v485_v1  ;;  %v517_v16 = vpop.trf.xlu1 }
 0x199   : > { %720 = vmatprep.mubr.f32.mxu1 %v1847_v0 }
 0x19b   : > { %v486_v2 = vpop.trf.xlu0 }
 0x19c   : > { %1464 = vmatmul.mubr.msk.f32.gmra.mrb[10].mxu1 %vm529_vm1, %v486_v2  ;;  %v518_v18 = vpop.trf.xlu1 }
 0x19d   : > { %726 = vmatprep.mubr.f32.mxu1 %v1847_v0 }
 0x19f   : > { %v487_v3 = vpop.trf.xlu0 }
 0x1a0   : > { %1465 = vmatmul.mubr.msk.f32.gmra.mrb[12].mxu1 %vm529_vm1, %v487_v3  ;;  %v519_v19 = vpop.trf.xlu1 }
 0x1a1   : > { %732 = vmatprep.mubr.f32.mxu1 %v1847_v0 }
 0x1a3   : > { %v488_v4 = vpop.trf.xlu0 }
 0x1a4   : > { %1466 = vmatmul.mubr.msk.f32.gmra.mrb[14].mxu1 %vm529_vm1, %v488_v4  ;;  %v520_v20 = vpop.trf.xlu1 }
 0x1a5   : > { %738 = vmatprep.mubr.f32.mxu1 %v1847_v0 }
 0x1a7   : > { %v489_v5 = vpop.trf.xlu0 }
 0x1a8   : > { %1467 = vmatmul.mubr.msk.f32.gmra.mrb[16].mxu1 %vm529_vm1, %v489_v5  ;;  %v521_v21 = vpop.trf.xlu1 }
 0x1a9   : > { %744 = vmatprep.mubr.f32.mxu1 %v1847_v0 }
 0x1ab   : > { %v490_v7 = vpop.trf.xlu0 }
 0x1ac   : > { %1468 = vmatmul.mubr.msk.f32.gmra.mrb[18].mxu1 %vm529_vm1, %v490_v7  ;;  %v522_v22 = vpop.trf.xlu1 }
 0x1ad   : > { %750 = vmatprep.mubr.f32.mxu1 %v1847_v0 }
 0x1af   : > { %v491_v9 = vpop.trf.xlu0 }
 0x1b0   : > { %1469 = vmatmul.mubr.msk.f32.gmra.mrb[20].mxu1 %vm529_vm1, %v491_v9  ;;  %v523_v23 = vpop.trf.xlu1 }
 0x1b1   : > { %756 = vmatprep.mubr.f32.mxu1 %v1847_v0 }
 0x1b3   : > { %v492_v10 = vpop.trf.xlu0 }
 0x1b4   : > { %1470 = vmatmul.mubr.msk.f32.gmra.mrb[22].mxu1 %vm529_vm1, %v492_v10  ;;  %v524_v24 = vpop.trf.xlu1 }
 0x1b5   : > { %762 = vmatprep.mubr.f32.mxu1 %v1847_v0 }
 0x1b7   : > { %v493_v12 = vpop.trf.xlu0 }
 0x1b8   : > { %1471 = vmatmul.mubr.msk.f32.gmra.mrb[24].mxu1 %vm529_vm1, %v493_v12  ;;  %v525_v28 = vpop.trf.xlu1 }
 0x1b9   : > { %768 = vmatprep.mubr.f32.mxu1 %v1847_v0 }
 0x1bb   : > { %v494_v14 = vpop.trf.xlu0 }
 0x1bc   : > { %1472 = vmatmul.mubr.msk.f32.gmra.mrb[26].mxu1 %vm529_vm1, %v494_v14  ;;  %v526_v29 = vpop.trf.xlu1 }
 0x1bd   : > { %774 = vmatprep.mubr.f32.mxu1 %v1847_v0 }
 0x1bf   : > { %v495_v15 = vpop.trf.xlu0 }
 0x1c0   : > { %1473 = vmatmul.mubr.msk.f32.gmra.mrb[28].mxu1 %vm529_vm1, %v495_v15  ;;  %v527_v30 = vpop.trf.xlu1 }
 0x1c1   : > { %780 = vmatprep.mubr.f32.mxu1 %v1847_v0 }
 0x1c3   : > { %v496_v17 = vpop.trf.xlu0 }
 0x1c4   : > { %1474 = vmatmul.mubr.msk.f32.gmra.mrb[30].mxu1 %vm529_vm1, %v496_v17  ;;  %v528_v31 = vpop.trf.xlu1 }
 0x1c5   : > { %786 = vmatprep.mubr.f32.mxu1 %v1847_v0 }
 0x1c8   : > { %1475 = vmatmul.mubr.msk.f32.gmra.mrb[32].mxu1 %vm529_vm1, %v513_v6 }
 0x1c9   : > { %792 = vmatprep.mubr.f32.mxu1 %v1847_v0 }
 0x1cc   : > { %1476 = vmatmul.mubr.msk.f32.gmra.mrb[34].mxu1 %vm529_vm1, %v514_v8 }
 0x1cd   : > { %798 = vmatprep.mubr.f32.mxu1 %v1847_v0 }
 0x1d0   : > { %1477 = vmatmul.mubr.msk.f32.gmra.mrb[36].mxu1 %vm529_vm1, %v515_v11 }
 0x1d1   : > { %804 = vmatprep.mubr.f32.mxu1 %v1847_v0 }
 0x1d4   : > { %1478 = vmatmul.mubr.msk.f32.gmra.mrb[38].mxu1 %vm529_vm1, %v516_v13 }
 0x1d5   : > { %810 = vmatprep.mubr.f32.mxu1 %v1847_v0 }
 0x1d8   : > { %1479 = vmatmul.mubr.msk.f32.gmra.mrb[40].mxu1 %vm529_vm1, %v517_v16 }
 0x1d9   : > { %816 = vmatprep.mubr.f32.mxu1 %v1847_v0 }
 0x1dc   : > { %1480 = vmatmul.mubr.msk.f32.gmra.mrb[42].mxu1 %vm529_vm1, %v518_v18 }
 0x1dd   : > { %822 = vmatprep.mubr.f32.mxu1 %v1847_v0 }
 0x1e0   : > { %1481 = vmatmul.mubr.msk.f32.gmra.mrb[44].mxu1 %vm529_vm1, %v519_v19 }
 0x1e1   : > { %828 = vmatprep.mubr.f32.mxu1 %v1847_v0 }
 0x1e4   : > { %1482 = vmatmul.mubr.msk.f32.gmra.mrb[46].mxu1 %vm529_vm1, %v520_v20 }
 0x1e5   : > { %834 = vmatprep.mubr.f32.mxu1 %v1847_v0 }
 0x1e8   : > { %1483 = vmatmul.mubr.msk.f32.gmra.mrb[48].mxu1 %vm529_vm1, %v521_v21 }
 0x1e9   : > { %840 = vmatprep.mubr.f32.mxu1 %v1847_v0 }
 0x1eb   : > { %v263_v25 = vpop.permute.xlu0 %262 }
 0x1ec   : > { %v2082_v26 = vadd.f32 %v2003_v48, %v263_v25  ;;  %v398_v27 = vadd.f32 %v2005_v49, %v263_v25  ;;  %1484 = vmatmul.mubr.msk.f32.gmra.mrb[50].mxu1 %vm529_vm1, %v522_v22 }
 0x1ed   : > { %846 = vmatprep.mubr.f32.mxu1 %v1847_v0 }
 0x1ee   : > { %2867 = vst [vmem:[#allocation13_spill] sm:$0xff] %v2082_v26  ;;  %1291 = vmatprep.mubr.f32.mxu0 %v398_v27 }
 0x1f0   : > { %1485 = vmatmul.mubr.msk.f32.gmra.mrb[52].mxu1 %vm529_vm1, %v523_v23 }
 0x1f1   : > { %852 = vmatprep.mubr.f32.mxu1 %v1847_v0 }
 0x1f4   : > { %1486 = vmatmul.mubr.msk.f32.gmra.mrb[54].mxu1 %vm529_vm1, %v524_v24 }
 0x1f5   : > { %858 = vmatprep.mubr.f32.mxu1 %v1847_v0 }
 0x1f8   : > { %1487 = vmatmul.mubr.msk.f32.gmra.mrb[56].mxu1 %vm529_vm1, %v525_v28 }
 0x1f9   : > { %864 = vmatprep.mubr.f32.mxu1 %v1847_v0 }
 0x1fc   : > { %1488 = vmatmul.mubr.msk.f32.gmra.mrb[58].mxu1 %vm529_vm1, %v526_v29 }
 0x1fd   : > { %870 = vmatprep.mubr.f32.mxu1 %v1847_v0 }
 0x200   : > { %1489 = vmatmul.mubr.msk.f32.gmra.mrb[60].mxu1 %vm529_vm1, %v527_v30 }
 0x201   : > { %876 = vmatprep.mubr.f32.mxu1 %v1847_v0 }
 0x204   : > { %1490 = vmatmul.mubr.msk.f32.gmra.mrb[62].mxu1 %vm529_vm1, %v528_v31 }
 0x25b   : > { %v2098_v32 = vpop.f32.mrb[0].mxu1 }
 0x25c   : > { %v2100_v33 = vpop.f32.mrb[1].mxu1 }
 0x25f   : > { %v2102_v34 = vpop.f32.mrb[2].mxu1 }
 0x260   : > { %v2104_v35 = vpop.f32.mrb[3].mxu1 }
 0x263   : > { %v2106_v36 = vpop.f32.mrb[4].mxu1 }
 0x264   : > { %v883_v37 = vmax.f32 %v2098_v32, %v2106_v36  ;;  %v2110_v38 = vpop.f32.mrb[5].mxu1 }
 0x265   : > { %v920_v0 = vmax.f32 %v2100_v33, %v2110_v38 }
 0x267   : > { %v2114_v39 = vpop.f32.mrb[6].mxu1 }
 0x268   : > { %v884_v40 = vmax.f32 %v2102_v34, %v2114_v39  ;;  %v2118_v41 = vpop.f32.mrb[7].mxu1 }
 0x269   : > { %v921_v42 = vmax.f32 %v2104_v35, %v2118_v41 }
 0x26b   : > { %v2122_v43 = vpop.f32.mrb[8].mxu1 }
 0x26c   : > { %v885_v44 = vmax.f32 %v883_v37, %v2122_v43  ;;  %v2125_v45 = vpop.f32.mrb[9].mxu1 }
 0x26d   : > { %v922_v46 = vmax.f32 %v920_v0, %v2125_v45 }
 0x26f   : > { %v2128_v47 = vpop.f32.mrb[10].mxu1 }
 0x270   : > { %v886_v48 = vmax.f32 %v884_v40, %v2128_v47  ;;  %v2131_v49 = vpop.f32.mrb[11].mxu1 }
 0x271   : > { %v923_v51 = vmax.f32 %v921_v42, %v2131_v49 }
 0x273   : > { %v2134_v54 = vpop.f32.mrb[12].mxu1 }
 0x274   : > { %v887_v58 = vmax.f32 %v885_v44, %v2134_v54  ;;  %v2137_v59 = vpop.f32.mrb[13].mxu1 }
 0x275   : > { %v924_v60 = vmax.f32 %v922_v46, %v2137_v59 }
 0x277   : > { %v2140_v61 = vpop.f32.mrb[14].mxu1 }
 0x278   : > { %v888_v62 = vmax.f32 %v886_v48, %v2140_v61  ;;  %v2143_v63 = vpop.f32.mrb[15].mxu1 }
 0x279   : > { %v925_v1 = vmax.f32 %v923_v51, %v2143_v63 }
 0x27b   : > { %v2146_v2 = vpop.f32.mrb[16].mxu1 }
 0x27c   : > { %v889_v3 = vmax.f32 %v887_v58, %v2146_v2  ;;  %v2149_v4 = vpop.f32.mrb[17].mxu1 }
 0x27d   : > { %v926_v5 = vmax.f32 %v924_v60, %v2149_v4 }
 0x27f   : > { %v2152_v6 = vpop.f32.mrb[18].mxu1 }
 0x280   : > { %v890_v7 = vmax.f32 %v888_v62, %v2152_v6  ;;  %v2155_v8 = vpop.f32.mrb[19].mxu1 }
 0x281   : > { %v927_v9 = vmax.f32 %v925_v1, %v2155_v8 }
 0x283   : > { %v2158_v10 = vpop.f32.mrb[20].mxu1 }
 0x284   : > { %v891_v11 = vmax.f32 %v889_v3, %v2158_v10  ;;  %v2161_v12 = vpop.f32.mrb[21].mxu1 }
 0x285   : > { %v928_v13 = vmax.f32 %v926_v5, %v2161_v12 }
 0x287   : > { %v2164_v14 = vpop.f32.mrb[22].mxu1 }
 0x288   : > { %v892_v15 = vmax.f32 %v890_v7, %v2164_v14  ;;  %v2167_v16 = vpop.f32.mrb[23].mxu1 }
 0x289   : > { %2868 = vst [vmem:[#allocation14_spill] sm:$0xff] %v2167_v16  ;;  %v929_v17 = vmax.f32 %v927_v9, %v2167_v16 }
 0x28b   : > { %v2170_v18 = vpop.f32.mrb[24].mxu1 }
 0x28c   : > { %v893_v19 = vmax.f32 %v891_v11, %v2170_v18  ;;  %v2173_v20 = vpop.f32.mrb[25].mxu1 }
 0x28d   : > { %2869 = vst [vmem:[#allocation15_spill] sm:$0xff] %v2173_v20  ;;  %v930_v21 = vmax.f32 %v928_v13, %v2173_v20 }
 0x28f   : > { %v2176_v22 = vpop.f32.mrb[26].mxu1 }
 0x290   : > { %v894_v23 = vmax.f32 %v892_v15, %v2176_v22  ;;  %v2179_v24 = vpop.f32.mrb[27].mxu1 }
 0x291   : > { %2870 = vst [vmem:[#allocation16_spill] sm:$0xff] %v2179_v24  ;;  %v931_v25 = vmax.f32 %v929_v17, %v2179_v24 }
 0x293   : > { %v2182_v27 = vpop.f32.mrb[28].mxu1 }
 0x294   : > { %v895_v28 = vmax.f32 %v893_v19, %v2182_v27  ;;  %v2185_v29 = vpop.f32.mrb[29].mxu1 }
 0x295   : > { %2871 = vst [vmem:[#allocation17_spill] sm:$0xff] %v2185_v29  ;;  %v932_v30 = vmax.f32 %v930_v21, %v2185_v29 }
 0x297   : > { %v2188_v31 = vpop.f32.mrb[30].mxu1 }
 0x298   : > { %v896_v37 = vmax.f32 %v894_v23, %v2188_v31  ;;  %v2191_v0 = vpop.f32.mrb[31].mxu1 }
 0x299   : > { %2872 = vst [vmem:[#allocation18_spill] sm:$0xff] %v2191_v0  ;;  %v933_v40 = vmax.f32 %v931_v25, %v2191_v0 }
 0x29b   : > { %v2194_v42 = vpop.f32.mrb[32].mxu1 }
 0x29c   : > { %v897_v44 = vmax.f32 %v895_v28, %v2194_v42  ;;  %v2197_v46 = vpop.f32.mrb[33].mxu1 }
 0x29d   : > { %2873 = vst [vmem:[#allocation19_spill] sm:$0xff] %v2197_v46  ;;  %v934_v48 = vmax.f32 %v932_v30, %v2197_v46 }
 0x29f   : > { %v2200_v51 = vpop.f32.mrb[34].mxu1 }
 0x2a0   : > { %v898_v58 = vmax.f32 %v896_v37, %v2200_v51  ;;  %v2203_v60 = vpop.f32.mrb[35].mxu1 }
 0x2a1   : > { %2874 = vst [vmem:[#allocation20_spill] sm:$0xff] %v2203_v60  ;;  %v935_v62 = vmax.f32 %v933_v40, %v2203_v60 }
 0x2a3   : > { %v2206_v1 = vpop.f32.mrb[36].mxu1 }
 0x2a4   : > { %v899_v3 = vmax.f32 %v897_v44, %v2206_v1  ;;  %v2209_v5 = vpop.f32.mrb[37].mxu1 }
 0x2a5   : > { %2875 = vst [vmem:[#allocation21_spill] sm:$0xff] %v2209_v5  ;;  %v936_v7 = vmax.f32 %v934_v48, %v2209_v5 }
 0x2a7   : > { %v2212_v9 = vpop.f32.mrb[38].mxu1 }
 0x2a8   : > { %v900_v11 = vmax.f32 %v898_v58, %v2212_v9  ;;  %v2215_v13 = vpop.f32.mrb[39].mxu1 }
 0x2a9   : > { %2876 = vst [vmem:[#allocation22_spill] sm:$0xff] %v2215_v13  ;;  %v937_v15 = vmax.f32 %v935_v62, %v2215_v13 }
 0x2ab   : > { %v2218_v17 = vpop.f32.mrb[40].mxu1 }
 0x2ac   : > { %v901_v19 = vmax.f32 %v899_v3, %v2218_v17  ;;  %v2221_v21 = vpop.f32.mrb[41].mxu1 }
 0x2ad   : > { %2877 = vst [vmem:[#allocation23_spill] sm:$0xff] %v2221_v21  ;;  %v938_v23 = vmax.f32 %v936_v7, %v2221_v21 }
 0x2af   : > { %v2224_v25 = vpop.f32.mrb[42].mxu1 }
 0x2b0   : > { %v902_v28 = vmax.f32 %v900_v11, %v2224_v25  ;;  %v2227_v30 = vpop.f32.mrb[43].mxu1 }
 0x2b1   : > { %2878 = vst [vmem:[#allocation24_spill] sm:$0xff] %v2227_v30  ;;  %v939_v37 = vmax.f32 %v937_v15, %v2227_v30 }
 0x2b3   : > { %v2230_v40 = vpop.f32.mrb[44].mxu1 }
 0x2b4   : > { %v903_v44 = vmax.f32 %v901_v19, %v2230_v40  ;;  %v2233_v48 = vpop.f32.mrb[45].mxu1 }
 0x2b5   : > { %2879 = vst [vmem:[#allocation25_spill] sm:$0xff] %v2233_v48  ;;  %v940_v58 = vmax.f32 %v938_v23, %v2233_v48 }
 0x2b7   : > { %v2236_v62 = vpop.f32.mrb[46].mxu1 }
 0x2b8   : > { %v904_v3 = vmax.f32 %v902_v28, %v2236_v62  ;;  %v2239_v7 = vpop.f32.mrb[47].mxu1 }
 0x2b9   : > { %2880 = vst [vmem:[#allocation26_spill] sm:$0xff] %v2239_v7  ;;  %v941_v11 = vmax.f32 %v939_v37, %v2239_v7 }
 0x2bb   : > { %v2242_v56 = vpop.f32.mrb[48].mxu1 }
 0x2bc   : > { %v905_v15 = vmax.f32 %v903_v44, %v2242_v56  ;;  %v2245_v57 = vpop.f32.mrb[49].mxu1 }
 0x2bd   : > { %2881 = vst [vmem:[#allocation27_spill] sm:$0xff] %v2245_v57  ;;  %v942_v19 = vmax.f32 %v940_v58, %v2245_v57 }
 0x2bf   : > { %v2248_v53 = vpop.f32.mrb[50].mxu1 }
 0x2c0   : > { %v906_v23 = vmax.f32 %v904_v3, %v2248_v53  ;;  %v2251_v55 = vpop.f32.mrb[51].mxu1 }
 0x2c1   : > { %2882 = vst [vmem:[#allocation28_spill] sm:$0xff] %v2251_v55  ;;  %v943_v28 = vmax.f32 %v941_v11, %v2251_v55 }
 0x2c3   : > { %v2254_v50 = vpop.f32.mrb[52].mxu1 }
 0x2c4   : > { %v907_v37 = vmax.f32 %v905_v15, %v2254_v50  ;;  %v2257_v26 = vpop.f32.mrb[53].mxu1 }
 0x2c5   : > { %2883 = vst [vmem:[#allocation29_spill] sm:$0xff] %v2257_v26  ;;  %v944_v44 = vmax.f32 %v942_v19, %v2257_v26 }
 0x2c7   : > { %v2260_v52 = vpop.f32.mrb[54].mxu1 }
 0x2c8   : > { %v908_v58 = vmax.f32 %v906_v23, %v2260_v52  ;;  %v2263_v57 = vpop.f32.mrb[55].mxu1 }
 0x2c9   : > { %2884 = vst [vmem:[#allocation30_spill] sm:$0xff] %v2263_v57  ;;  %v945_v3 = vmax.f32 %v943_v28, %v2263_v57 }
 0x2cb   : > { %v2266_v7 = vpop.f32.mrb[56].mxu1 }
 0x2cc   : > { %v909_v11 = vmax.f32 %v907_v37, %v2266_v7  ;;  %v2269_v55 = vpop.f32.mrb[57].mxu1 }
 0x2cd   : > { %2885 = vst [vmem:[#allocation31_spill] sm:$0xff] %v2269_v55  ;;  %v946_v15 = vmax.f32 %v944_v44, %v2269_v55 }
 0x2cf   : > { %v2272_v48 = vpop.f32.mrb[58].mxu1 }
 0x2d0   : > { %v910_v19 = vmax.f32 %v908_v58, %v2272_v48  ;;  %v2275_v26 = vpop.f32.mrb[59].mxu1 }
 0x2d1   : > { %2886 = vst [vmem:[#allocation32_spill] sm:$0xff] %v2275_v26  ;;  %v947_v23 = vmax.f32 %v945_v3, %v2275_v26 }
 0x2d3   : > { %v2278_v30 = vpop.f32.mrb[60].mxu1 }
 0x2d4   : > { %v911_v28 = vmax.f32 %v909_v11, %v2278_v30  ;;  %v2281_v57 = vpop.f32.mrb[61].mxu1 }
 0x2d5   : > { %2887 = vst [vmem:[#allocation33_spill] sm:$0xff] %v2281_v57  ;;  %v948_v37 = vmax.f32 %v946_v15, %v2281_v57 }
 0x2d7   : > { %v2284_v21 = vpop.f32.mrb[62].mxu1 }
 0x2d8   : > { %v912_v44 = vmax.f32 %v910_v19, %v2284_v21  ;;  %v2287_v55 = vpop.f32.mrb[63].mxu1 }
 0x2d9   : > { %2888 = vst [vmem:[#allocation34_spill] sm:$0xff] %v2287_v55  ;;  %v949_v58 = vmax.f32 %v947_v23, %v2287_v55 }
 0x2da   : > { %v913_v13 = vmax.f32 %v911_v28, %v912_v44 }
 0x2db   : > { %v950_v5 = vmax.f32 %v948_v37, %v949_v58 }
 0x2dc   : > { %v914_v60 = vrot.slane %v913_v13, 4 }
 0x2dd   : > { %v951_v3 = vrot.slane %v950_v5, 4 }
 0x2de   : > { %v915_v26 = vmax.f32 %v913_v13, %v914_v60 }
 0x2df   : > { %v952_v46 = vmax.f32 %v950_v5, %v951_v3 }
 0x2e0   : > { %v916_v0 = vrot.slane %v915_v26, 2 }
 0x2e1   : > { %v953_v11 = vrot.slane %v952_v46, 2 }
 0x2e2   : > { %v917_v29 = vmax.f32 %v915_v26, %v916_v0  ;;  %v2908_v0 = vld [vmem:[#allocation33_spill] sm:$0xff] }
 0x2e3   : > { %v954_v24 = vmax.f32 %v952_v46, %v953_v11 }
 0x2e4   : > { %v918_v20 = vrot.slane %v917_v29, 1 }
 0x2e5   : > { %v955_v15 = vrot.slane %v954_v24, 1 }
 0x2e6   : > { %v2290_v57 = vmax.f32 %v917_v29, %v918_v20 }
 0x2e7   : > { %v2292_v16 = vmax.f32 %v954_v24, %v955_v15 }
 0x2e8   : > { %v957_v19 = vsub.f32 %v2098_v32, %v2290_v57  ;;  %v959_v23 = vsub.f32 %v2102_v34, %v2290_v57  ;;  %v961_v60 = vsub.f32 %v2106_v36, %v2290_v57  ;;  %v963_v5 = vsub.f32 %v2114_v39, %v2290_v57 }
 0x2e9   : > { %v965_v26 = vsub.f32 %v2122_v43, %v2290_v57  ;;  %v967_v20 = vsub.f32 %v2128_v47, %v2290_v57  ;;  %v969_v24 = vsub.f32 %v2134_v54, %v2290_v57  ;;  %v971_v32 = vsub.f32 %v2140_v61, %v2290_v57 }
 0x2ea   : > { %v973_v34 = vsub.f32 %v2146_v2, %v2290_v57  ;;  %v975_v36 = vsub.f32 %v2152_v6, %v2290_v57  ;;  %v977_v39 = vsub.f32 %v2158_v10, %v2290_v57  ;;  %v979_v43 = vsub.f32 %v2164_v14, %v2290_v57 }
 0x2eb   : > { %v981_v47 = vsub.f32 %v2170_v18, %v2290_v57  ;;  %v983_v54 = vsub.f32 %v2176_v22, %v2290_v57  ;;  %v985_v61 = vsub.f32 %v2182_v27, %v2290_v57  ;;  %v987_v2 = vsub.f32 %v2188_v31, %v2290_v57 }
 0x2ec   : > { %v989_v6 = vsub.f32 %v2194_v42, %v2290_v57  ;;  %v991_v10 = vsub.f32 %v2200_v51, %v2290_v57  ;;  %v993_v14 = vsub.f32 %v2206_v1, %v2290_v57  ;;  %v995_v18 = vsub.f32 %v2212_v9, %v2290_v57 }
 0x2ed   : > { %v997_v22 = vsub.f32 %v2218_v17, %v2290_v57  ;;  %v999_v27 = vsub.f32 %v2224_v25, %v2290_v57  ;;  %v1001_v29 = vsub.f32 %v2230_v40, %v2290_v57  ;;  %v1003_v31 = vsub.f32 %v2236_v62, %v2290_v57 }
 0x2ee   : > { %v1021_v25 = vmul.f32 1.442695, %v957_v19  ;;  %v1025_v40 = vmul.f32 1.442695, %v959_v23  ;;  %v1029_v62 = vmul.f32 1.442695, %v961_v60 }
 0x2ef   : > { %v1033_v37 = vmul.f32 1.442695, %v963_v5  ;;  %v1037_v58 = vmul.f32 1.442695, %v965_v26  ;;  %v1041_v3 = vmul.f32 1.442695, %v967_v20 }
 0x2f0   : > { %1635 = vpow2.f32 %v1021_v25  ;;  %v1045_v11 = vmul.f32 1.442695, %v969_v24  ;;  %v1049_v15 = vmul.f32 1.442695, %v971_v32  ;;  %v1053_v13 = vmul.f32 1.442695, %v973_v34 }
 0x2f1   : > { %1637 = vpow2.f32 %v1025_v40  ;;  %v1057_v17 = vmul.f32 1.442695, %v975_v36  ;;  %v1061_v19 = vmul.f32 1.442695, %v977_v39  ;;  %v1065_v23 = vmul.f32 1.442695, %v979_v43 }
 0x2f2   : > { %1639 = vpow2.f32 %v1029_v62  ;;  %v1069_v60 = vmul.f32 1.442695, %v981_v47  ;;  %v1073_v28 = vmul.f32 1.442695, %v983_v54  ;;  %v1077_v5 = vmul.f32 1.442695, %v985_v61 }
 0x2f3   : > { %1641 = vpow2.f32 %v1033_v37  ;;  %v1081_v9 = vmul.f32 1.442695, %v987_v2  ;;  %v1085_v44 = vmul.f32 1.442695, %v989_v6  ;;  %v1089_v25 = vmul.f32 1.442695, %v991_v10 }
 0x2f4   : > { %1643 = vpow2.f32 %v1037_v58  ;;  %v1093_v26 = vmul.f32 1.442695, %v993_v14  ;;  %v1097_v20 = vmul.f32 1.442695, %v995_v18  ;;  %v1101_v40 = vmul.f32 1.442695, %v997_v22 }
 0x2f5   : > { %1645 = vpow2.f32 %v1041_v3  ;;  %v2362_v24 = vmul.f32 1.442695, %v999_v27  ;;  %v2364_v32 = vmul.f32 1.442695, %v1001_v29  ;;  %v2366_v34 = vmul.f32 1.442695, %v1003_v31 }
 0x2f6   : > { %1647 = vpow2.f32 %v1045_v11  ;;  %v2889_v22 = vld [vmem:[#allocation14_spill] sm:$0xff]  ;;  %v2891_v62 = vld [vmem:[#allocation16_spill] sm:$0xff]  ;;  %v2892_v3 = vld [vmem:[#allocation17_spill] sm:$0xff] }
 0x2f7   : > { %1649 = vpow2.f32 %v1049_v15  ;;  %v2893_v15 = vld [vmem:[#allocation18_spill] sm:$0xff]  ;;  %v2895_v18 = vld [vmem:[#allocation20_spill] sm:$0xff]  ;;  %v2896_v14 = vld [vmem:[#allocation21_spill] sm:$0xff] }
 0x2f8   : > { %1651 = vpow2.f32 %v1053_v13  ;;  %v2890_v13 = vld [vmem:[#allocation15_spill] sm:$0xff]  ;;  %v2897_v11 = vld [vmem:[#allocation22_spill] sm:$0xff]  ;;  %v2899_v61 = vld [vmem:[#allocation24_spill] sm:$0xff] }
 0x2f9   : > { %1653 = vpow2.f32 %v1057_v17  ;;  %v2898_v2 = vld [vmem:[#allocation23_spill] sm:$0xff]  ;;  %v2900_v37 = vld [vmem:[#allocation25_spill] sm:$0xff]  ;;  %v2901_v43 = vld [vmem:[#allocation26_spill] sm:$0xff] }
 0x2fa   : > { %v2376_v54 = vpop.eup %1635  ;;  %1655 = vpow2.f32 %v1061_v19  ;;  %v2902_v19 = vld [vmem:[#allocation27_spill] sm:$0xff]  ;;  %v2903_v36 = vld [vmem:[#allocation28_spill] sm:$0xff] }
 0x2fb   : > { %v2384_v10 = vpop.eup %1637  ;;  %1657 = vpow2.f32 %v1065_v23  ;;  %v2894_v23 = vld [vmem:[#allocation19_spill] sm:$0xff] }
 0x2fc   : > { %v2392_v29 = vpop.eup %1639  ;;  %1659 = vpow2.f32 %v1069_v60  ;;  %v1149_v31 = vadd.f32 %v2384_v10, %v2376_v54  ;;  %v2907_v60 = vld [vmem:[#allocation32_spill] sm:$0xff] }
 0x2fd   : > { %v2400_v58 = vpop.eup %1641  ;;  %1661 = vpow2.f32 %v1073_v28  ;;  %v2905_v28 = vld [vmem:[#allocation30_spill] sm:$0xff] }
 0x2fe   : > { %v2408_v27 = vpop.eup %1643  ;;  %1663 = vpow2.f32 %v1077_v5  ;;  %v1150_v17 = vadd.f32 %v2392_v29, %v1149_v31 }
 0x2ff   : > { %v2415_v6 = vpop.eup %1645  ;;  %1665 = vpow2.f32 %v1081_v9 }
 0x300   : > { %v2423_v47 = vpop.eup %1647  ;;  %1667 = vpow2.f32 %v1085_v44  ;;  %v1151_v31 = vadd.f32 %v2400_v58, %v1150_v17 }
 0x301   : > { %v2430_v39 = vpop.eup %1649  ;;  %1669 = vpow2.f32 %v1089_v25 }
 0x302   : > { %v2438_v51 = vpop.eup %1651  ;;  %1671 = vpow2.f32 %v1093_v26  ;;  %v1152_v17 = vadd.f32 %v2408_v27, %v1151_v31  ;;  %v2909_v31 = vsub.f32 %v2242_v56, %v2290_v57 }
 0x303   : > { %v2445_v42 = vpop.eup %1653  ;;  %1673 = vpow2.f32 %v1097_v20  ;;  %v2910_v20 = vsub.f32 %v2248_v53, %v2290_v57 }
 0x304   : > { %v2453_v1 = vpop.eup %1655  ;;  %1675 = vpow2.f32 %v1101_v40  ;;  %v1117_v9 = vmul.f32 1.442695, %v2909_v31  ;;  %v1153_v25 = vadd.f32 %v2415_v6, %v1152_v17  ;;  %v2911_v40 = vsub.f32 %v2254_v50, %v2290_v57 }
 0x305   : > { %v2459_v46 = vpop.eup %1657  ;;  %1677 = vpow2.f32 %v2362_v24  ;;  %v1121_v44 = vmul.f32 1.442695, %v2910_v20  ;;  %v2912_v24 = vsub.f32 %v2260_v52, %v2290_v57  ;;  %v2916_v52 = vsub.f32 %v2278_v30, %v2290_v57 }
 0x306   : > { %v2465_v5 = vpop.eup %1659  ;;  %1679 = vpow2.f32 %v2364_v32  ;;  %v1125_v26 = vmul.f32 1.442695, %v2911_v40  ;;  %v1154_v56 = vadd.f32 %v2423_v47, %v1153_v25  ;;  %v2913_v32 = vsub.f32 %v2266_v7, %v2290_v57 }
 0x307   : > { %v2472_v31 = vpop.eup %1661  ;;  %1681 = vpow2.f32 %v2366_v34  ;;  %v1129_v17 = vmul.f32 1.442695, %v2912_v24  ;;  %v2914_v25 = vsub.f32 %v2272_v48, %v2290_v57 }
 0x308   : > { %v2478_v53 = vpop.eup %1663  ;;  %1683 = vpow2.f32 %v1117_v9  ;;  %v1133_v20 = vmul.f32 1.442695, %v2913_v32  ;;  %v1155_v50 = vadd.f32 %v2430_v39, %v1154_v56  ;;  %v1141_v9 = vmul.f32 1.442695, %v2916_v52 }
 0x309   : > { %v2484_v40 = vpop.eup %1665  ;;  %1685 = vpow2.f32 %v1121_v44  ;;  %v1137_v34 = vmul.f32 1.442695, %v2914_v25  ;;  %v2917_v56 = vsub.f32 %v2284_v21, %v2290_v57  ;;  %v2920_v57 = vsub.f32 %v2110_v38, %v2292_v16 }
 0x30a   : > { %v2489_v55 = vpop.eup %1667  ;;  %1687 = vpow2.f32 %v1125_v26  ;;  %v1156_v24 = vadd.f32 %v2438_v51, %v1155_v50  ;;  %v2918_v26 = vsub.f32 %v2100_v33, %v2292_v16  ;;  %v2919_v50 = vsub.f32 %v2104_v35, %v2292_v16 }
 0x30b   : > { %2915 = vst [vmem:[#allocation14_spill] sm:$0xff] %v2489_v55  ;;  %v2495_v7 = vpop.eup %1669  ;;  %1689 = vpow2.f32 %v1129_v17  ;;  %v1145_v44 = vmul.f32 1.442695, %v2917_v56  ;;  %v1031_v21 = vmul.f32 1.442695, %v2920_v57  ;;  %v2921_v33 = vsub.f32 %v2118_v41, %v2292_v16 }
 0x30c   : > { %v2500_v32 = vpop.eup %1671  ;;  %1691 = vpow2.f32 %v1133_v20  ;;  %v1157_v48 = vadd.f32 %v2445_v42, %v1156_v24  ;;  %v1023_v25 = vmul.f32 1.442695, %v2918_v26  ;;  %v1027_v17 = vmul.f32 1.442695, %v2919_v50 }
 0x30d   : > { %v2506_v30 = vpop.eup %1673  ;;  %1693 = vpow2.f32 %v1137_v34  ;;  %v1035_v24 = vmul.f32 1.442695, %v2921_v33  ;;  %v2922_v34 = vsub.f32 %v2125_v45, %v2292_v16  ;;  %v2923_v35 = vsub.f32 %v2131_v49, %v2292_v16 }
 0x30e   : > { %v2514_v52 = vpop.eup %1675  ;;  %1695 = vpow2.f32 %v1141_v9  ;;  %v1158_v20 = vadd.f32 %v2453_v1, %v1157_v48  ;;  %v2924_v9 = vsub.f32 %v2137_v59, %v2292_v16  ;;  %v2925_v48 = vsub.f32 %v2143_v63, %v2292_v16 }
 0x30f   : > { %v1039_v56 = vmul.f32 1.442695, %v2922_v34  ;;  %v2523_v26 = vpop.eup %1677  ;;  %1697 = vpow2.f32 %v1145_v44  ;;  %v1043_v38 = vmul.f32 1.442695, %v2923_v35  ;;  %v2926_v44 = vsub.f32 %v2149_v4, %v2292_v16 }
 0x310   : > { %v1047_v50 = vmul.f32 1.442695, %v2924_v9  ;;  %v1051_v41 = vmul.f32 1.442695, %v2925_v48  ;;  %v2534_v57 = vpop.eup %1679  ;;  %v1159_v45 = vadd.f32 %v2459_v46, %v1158_v20  ;;  %1699 = vpow2.f32 %v1023_v25 }
 0x311   : > { %v1055_v33 = vmul.f32 1.442695, %v2926_v44  ;;  %v2927_v49 = vsub.f32 %v2155_v8, %v2292_v16  ;;  %v2543_v35 = vpop.eup %1681  ;;  %1701 = vpow2.f32 %v1027_v17 }
 0x312   : > { %v2551_v20 = vpop.eup %1683  ;;  %v1160_v4 = vadd.f32 %v2465_v5, %v1159_v45  ;;  %1703 = vpow2.f32 %v1031_v21 }
 0x313   : > { %v1059_v34 = vmul.f32 1.442695, %v2927_v49  ;;  %v2558_v9 = vpop.eup %1685  ;;  %1705 = vpow2.f32 %v1035_v24  ;;  %v2928_v24 = vsub.f32 %v2161_v12, %v2292_v16  ;;  %v2929_v49 = vsub.f32 %v2889_v22, %v2292_v16 }
 0x314   : > { %v2566_v45 = vpop.eup %1687  ;;  %v1161_v21 = vadd.f32 %v2472_v31, %v1160_v4  ;;  %1707 = vpow2.f32 %v1039_v56 }
 0x315   : > { %v2573_v8 = vpop.eup %1689  ;;  %1709 = vpow2.f32 %v1043_v38  ;;  %v1063_v17 = vmul.f32 1.442695, %v2928_v24  ;;  %v1067_v44 = vmul.f32 1.442695, %v2929_v49 }
 0x316   : > { %v2581_v4 = vpop.eup %1691  ;;  %v1162_v56 = vadd.f32 %v2478_v53, %v1161_v21  ;;  %1711 = vpow2.f32 %v1047_v50  ;;  %v2930_v50 = vsub.f32 %v2890_v13, %v2292_v16  ;;  %v2935_v13 = vsub.f32 %v2895_v18, %v2292_v16 }
 0x317   : > { %v2589_v25 = vpop.eup %1693  ;;  %1713 = vpow2.f32 %v1051_v41  ;;  %v2931_v41 = vsub.f32 %v2891_v62, %v2292_v16  ;;  %v2934_v62 = vsub.f32 %v2894_v23, %v2292_v16  ;;  %v2938_v18 = vsub.f32 %v2898_v2, %v2292_v16 }
 0x318   : > { %v2594_v48 = vpop.eup %1695  ;;  %v1163_v63 = vadd.f32 %v2484_v40, %v1162_v56  ;;  %1715 = vpow2.f32 %v1055_v33  ;;  %v1071_v12 = vmul.f32 1.442695, %v2930_v50  ;;  %v2932_v33 = vsub.f32 %v2892_v3, %v2292_v16 }
 0x319   : > { %v2602_v24 = vpop.eup %1697  ;;  %1717 = vpow2.f32 %v1059_v34  ;;  %v1075_v22 = vmul.f32 1.442695, %v2931_v41  ;;  %v2933_v34 = vsub.f32 %v2893_v15, %v2292_v16  ;;  %v1087_v41 = vmul.f32 1.442695, %v2934_v62 }
 0x31a   : > { %v1700_v49 = vpop.eup %1699  ;;  %v1164_v38 = vadd.f32 %v2489_v55, %v1163_v63  ;;  %1719 = vpow2.f32 %v1063_v17  ;;  %v1079_v56 = vmul.f32 1.442695, %v2932_v33  ;;  %v2936_v15 = vsub.f32 %v2896_v14, %v2292_v16 }
 0x31b   : > { %v1702_v50 = vpop.eup %1701  ;;  %1721 = vpow2.f32 %v1067_v44  ;;  %v1083_v21 = vmul.f32 1.442695, %v2933_v34  ;;  %v1091_v44 = vmul.f32 1.442695, %v2935_v13  ;;  %v1103_v13 = vmul.f32 1.442695, %v2938_v18 }
 0x31c   : > { %v1704_v59 = vpop.eup %1703  ;;  %v1165_v63 = vadd.f32 %v2495_v7, %v1164_v38  ;;  %1723 = vpow2.f32 %v1071_v12  ;;  %v1186_v17 = vadd.f32 %v1702_v50, %v1700_v49  ;;  %v1510_v3 = vpack.c.bf16 %v1702_v50, %v1700_v49 }
 0x31d   : > { %v1706_v33 = vpop.eup %1705  ;;  %1725 = vpow2.f32 %v1075_v22  ;;  %v1095_v34 = vmul.f32 1.442695, %v2936_v15  ;;  %v2937_v22 = vsub.f32 %v2897_v11, %v2292_v16  ;;  %v2939_v14 = vpack.c.bf16 %v2384_v10, %v2376_v54 }
 0x31e   : > { %v1708_v55 = vpop.eup %1707  ;;  %v1166_v23 = vadd.f32 %v2500_v32, %v1165_v63  ;;  %1727 = vpow2.f32 %v1079_v56  ;;  %v1187_v62 = vadd.f32 %v1704_v59, %v1186_v17  ;;  %1511 = vmatprep.subr.bf16.mxu0 %v1510_v3  ;;  %v1514_v38 = vpack.c.bf16 %v1706_v33, %v1704_v59 }
 0x31f   : > { %v1710_v12 = vpop.eup %1709  ;;  %1729 = vpow2.f32 %v1083_v21  ;;  %v1099_v49 = vmul.f32 1.442695, %v2937_v22  ;;  %1513 = vmatpush1.bf16.msra.mxu0 %v2939_v14  ;;  %v2940_v11 = vsub.f32 %v2899_v61, %v2292_v16  ;;  %v2941_v2 = vsub.f32 %v2900_v37, %v2292_v16  ;;  %v2946_v14 = vld [vmem:[#allocation29_spill] sm:$0xff] }
 0x320   : > { %v1712_v50 = vpop.eup %1711  ;;  %v1167_v56 = vadd.f32 %v2506_v30, %v1166_v23  ;;  %1731 = vpow2.f32 %v1087_v41  ;;  %v1188_v63 = vadd.f32 %v1706_v33, %v1187_v62  ;;  %1515 = vmatprep.subr.bf16.mxu0 %v1514_v38  ;;  %v1518_v59 = vpack.c.bf16 %v1710_v12, %v1708_v55 }
 0x321   : > { %v1714_v21 = vpop.eup %1713  ;;  %1733 = vpow2.f32 %v1091_v44  ;;  %v1107_v17 = vmul.f32 1.442695, %v2940_v11  ;;  %v1111_v3 = vmul.f32 1.442695, %v2941_v2  ;;  %v2942_v33 = vsub.f32 %v2901_v43, %v2292_v16 }
 0x322   : > { %v1716_v15 = vpop.eup %1715  ;;  %v1168_v54 = vadd.f32 %v2514_v52, %v1167_v56  ;;  %1735 = vpow2.f32 %v1095_v34  ;;  %v1189_v10 = vadd.f32 %v1708_v55, %v1188_v63  ;;  %v1522_v23 = vpack.c.bf16 %v1714_v21, %v1712_v50 }
 0x323   : > { %v1718_v41 = vpop.eup %1717  ;;  %1737 = vpow2.f32 %v1099_v49  ;;  %v1115_v44 = vmul.f32 1.442695, %v2942_v33  ;;  %v2943_v61 = vsub.f32 %v2902_v19, %v2292_v16  ;;  %v2944_v37 = vpack.c.bf16 %v2400_v58, %v2392_v29 }
 0x324   : > { %v1720_v38 = vpop.eup %1719  ;;  %v1169_v22 = vadd.f32 %v2523_v26, %v1168_v54  ;;  %1739 = vpow2.f32 %v1103_v13  ;;  %v1190_v55 = vadd.f32 %v1710_v12, %v1189_v10  ;;  %v1526_v34 = vpack.c.bf16 %v1718_v41, %v1716_v15 }
 0x325   : > { %v1119_v62 = vmul.f32 1.442695, %v2943_v61  ;;  %1517 = vmatpush1.bf16.msra.mxu0 %v2944_v37  ;;  %v1722_v49 = vpop.eup %1721  ;;  %1741 = vpow2.f32 %v1107_v17  ;;  %v2945_v43 = vsub.f32 %v2903_v36, %v2292_v16  ;;  %v2947_v19 = vsub.f32 %v2946_v14, %v2292_v16  ;;  %v2949_v17 = vld [vmem:[#allocation31_spill] sm:$0xff] }
 0x326   : > { %1519 = vmatprep.subr.bf16.mxu0 %v1518_v59  ;;  %v1724_v63 = vpop.eup %1723  ;;  %v1170_v29 = vadd.f32 %v2534_v57, %v1169_v22  ;;  %1743 = vpow2.f32 %v1111_v3  ;;  %v1191_v58 = vadd.f32 %v1712_v50, %v1190_v55  ;;  %v1530_v11 = vpack.c.bf16 %v1722_v49, %v1720_v38 }
 0x327   : > { %v1123_v18 = vmul.f32 1.442695, %v2945_v43  ;;  %v1127_v56 = vmul.f32 1.442695, %v2947_v19  ;;  %v1726_v13 = vpop.eup %1725  ;;  %1745 = vpow2.f32 %v1115_v44  ;;  %v2948_v12 = vsub.f32 %v2905_v28, %v2292_v16 }
 0x328   : > { %v2950_v36 = vsub.f32 %v2949_v17, %v2292_v16  ;;  %v2951_v54 = vpack.c.bf16 %v2415_v6, %v2408_v27  ;;  %v1728_v10 = vpop.eup %1727  ;;  %v1171_v33 = vadd.f32 %v2543_v35, %v1170_v29  ;;  %1747 = vpow2.f32 %v1119_v62 }
 0x329   : > { %v1131_v59 = vmul.f32 1.442695, %v2948_v12  ;;  %v1192_v50 = vadd.f32 %v1714_v21, %v1191_v58  ;;  %v1534_v3 = vpack.c.bf16 %v1726_v13, %v1724_v63  ;;  %v1730_v44 = vpop.eup %1729  ;;  %1749 = vpow2.f32 %v1123_v18  ;;  %v2954_v21 = vld [vmem:[#allocation34_spill] sm:$0xff] }
 0x32a   : > { %v1135_v2 = vmul.f32 1.442695, %v2950_v36  ;;  %1521 = vmatpush1.bf16.msra.mxu0 %v2951_v54  ;;  %v2952_v28 = vsub.f32 %v2907_v60, %v2292_v16  ;;  %v2953_v37 = vsub.f32 %v2908_v0, %v2292_v16  ;;  %v1732_v55 = vpop.eup %1731  ;;  %v1172_v6 = vadd.f32 %v2551_v20, %v1171_v33 }
 0x32b   : > { %1523 = vmatprep.subr.bf16.mxu0 %v1522_v23  ;;  %1751 = vpow2.f32 %v1127_v56  ;;  %v1193_v27 = vadd.f32 %v1716_v15, %v1192_v50  ;;  %v1538_v43 = vpack.c.bf16 %v1730_v44, %v1728_v10  ;;  %v1734_v62 = vpop.eup %1733  ;;  %v2955_v23 = vsub.f32 %v2954_v21, %v2292_v16 }
 0x32c   : > { %v1139_v61 = vmul.f32 1.442695, %v2952_v28  ;;  %v1143_v22 = vmul.f32 1.442695, %v2953_v37  ;;  %1753 = vpow2.f32 %v1131_v59  ;;  %v2956_v60 = vpack.c.bf16 %v2430_v39, %v2423_v47  ;;  %v1736_v14 = vpop.eup %1735 }
 0x32d   : > { %v1147_v18 = vmul.f32 1.442695, %v2955_v23  ;;  %v1173_v0 = vadd.f32 %v2558_v9, %v1172_v6  ;;  %1755 = vpow2.f32 %v1135_v2  ;;  %v1194_v19 = vadd.f32 %v1718_v41, %v1193_v27  ;;  %v1738_v56 = vpop.eup %1737 }
 0x32e   : > { %1525 = vmatpush1.bf16.msra.mxu0 %v2956_v60  ;;  %v1542_v29 = vpack.c.bf16 %v1734_v62, %v1732_v55  ;;  %1757 = vpow2.f32 %v1139_v61  ;;  %v1740_v15 = vpop.eup %1739  ;;  %v1546_v16 = vpack.c.bf16 %v1738_v56, %v1736_v14  ;;  %v2957_v39 = vpack.c.bf16 %v2445_v42, %v2438_v51 }
 0x32f   : > { %1527 = vmatprep.subr.bf16.mxu0 %v1526_v34  ;;  %v1174_v58 = vadd.f32 %v2566_v45, %v1173_v0  ;;  %1759 = vpow2.f32 %v1143_v22  ;;  %v1195_v12 = vadd.f32 %v1720_v38, %v1194_v19  ;;  %v1742_v59 = vpop.eup %1741  ;;  %v2958_v28 = vpack.c.bf16 %v2459_v46, %v2453_v1 }
 0x330   : > { %1761 = vpow2.f32 %v1147_v18  ;;  %v1744_v47 = vpop.eup %1743  ;;  %v1550_v34 = vpack.c.bf16 %v1742_v59, %v1740_v15  ;;  %v2960_v0 = vpack.c.bf16 %v2484_v40, %v2478_v53  ;;  %v2964_v53 = vpack.c.bf16 %v2523_v26, %v2514_v52 }
 0x331   : > { %v1175_v17 = vadd.f32 %v2573_v8, %v1174_v58  ;;  %v1196_v41 = vadd.f32 %v1722_v49, %v1195_v12  ;;  %v1746_v36 = vpop.eup %1745  ;;  %v2961_v58 = vld [vmem:[#allocation14_spill] sm:$0xff]  ;;  %v2967_v52 = vpack.c.bf16 %v2573_v8, %v2566_v45  ;;  %v2972_v8 = vld [vmem:[#allocation7_spill] sm:$0xff] }
 0x332   : > { %1529 = vmatpush1.bf16.msra.mxu0 %v2957_v39  ;;  %v1748_v2 = vpop.eup %1747  ;;  %v1554_v50 = vpack.c.bf16 %v1746_v36, %v1744_v47  ;;  %v273_v39 = vpop.permute.xlu0 %272 }
 0x333   : > { %1531 = vmatprep.subr.bf16.mxu0 %v1530_v11  ;;  %v1176_v54 = vadd.f32 %v2581_v4, %v1175_v17  ;;  %v1197_v33 = vadd.f32 %v1724_v63, %v1196_v41  ;;  %v1750_v38 = vpop.eup %1749  ;;  %v2959_v63 = vpack.c.bf16 %v2472_v31, %v2465_v5  ;;  %v2962_v5 = vpack.c.bf16 %v2495_v7, %v2961_v58  ;;  %v2973_v17 = vld [vmem:[#allocation10_spill] sm:$0xff] }
 0x334   : > { %v1558_v37 = vpack.c.bf16 %v1750_v38, %v1748_v2  ;;  %v2965_v7 = vpack.c.bf16 %v2543_v35, %v2534_v57  ;;  %v2968_v57 = vpack.c.bf16 %v2589_v25, %v2581_v4  ;;  %v410_v41 = vadd.f32 %v2973_v17, %v273_v39 }
 0x335   : > { %v1752_v61 = vpop.eup %1751  ;;  %v1177_v42 = vadd.f32 %v2589_v25, %v1176_v54  ;;  %v1198_v51 = vadd.f32 %v1726_v13, %v1197_v33  ;;  %v2974_v25 = vld [vmem:[#allocation9_spill] sm:$0xff] }
 0x336   : > { %1533 = vmatpush1.bf16.msra.mxu0 %v2958_v28  ;;  %v1754_v49 = vpop.eup %1753  ;;  %v408_v4 = vadd.f32 %v2974_v25, %v273_v39  ;;  %v464_v39 = vld [vmem:[%s1954_s16 + $0x38] sm:$0xff] }
 0x337   : > { %1535 = vmatprep.subr.bf16.mxu0 %v1534_v3  ;;  %v1756_v11 = vpop.eup %1755  ;;  %v1178_v22 = vadd.f32 %v2594_v48, %v1177_v42  ;;  %v1199_v6 = vadd.f32 %v1728_v10, %v1198_v51  ;;  %v1562_v27 = vpack.c.bf16 %v1754_v49, %v1752_v61 }
 0x338   : > { %v1758_v21 = vpop.eup %1757 }
 0x339   : > { %v1760_v23 = vpop.eup %1759  ;;  %v1179_v46 = vadd.f32 %v2602_v24, %v1178_v22  ;;  %v1200_v1 = vadd.f32 %v1730_v44, %v1199_v6  ;;  %v1566_v18 = vpack.c.bf16 %v1758_v21, %v1756_v11  ;;  %v2963_v44 = vpack.c.bf16 %v2506_v30, %v2500_v32 }
 0x33a   : > { %1537 = vmatpush1.bf16.msra.mxu0 %v2959_v63  ;;  %v1762_v13 = vpop.eup %1761  ;;  %v2966_v32 = vpack.c.bf16 %v2558_v9, %v2551_v20  ;;  %v2969_v20 = vpack.c.bf16 %v2602_v24, %v2594_v48  ;;  %v2970_v9 = vld [vmem:[#allocation8_spill] sm:$0xff]  ;;  %v2976_v48 = vld [vmem:[#allocation11_spill] sm:$0xff] }
 0x33b   : > { %1539 = vmatprep.subr.bf16.mxu0 %v1538_v43  ;;  %v1201_v3 = vadd.f32 %v1732_v55, %v1200_v1  ;;  %v1570_v60 = vpack.c.bf16 %v1762_v13, %v1760_v23  ;;  %v1180_v54 = vrot.slane %v1179_v46, 4  ;;  %v457_v1 = vld [vmem:[%s1954_s16] sm:$0xff] }
 0x33d   : > { %v1202_v10 = vadd.f32 %v1734_v62, %v1201_v3  ;;  %v458_v3 = vld [vmem:[%s1954_s16 + $0x8] sm:$0xff] }
 0x33e   : > { %1541 = vmatpush1.bf16.msra.mxu0 %v2960_v0 }
 0x33f   : > { %1543 = vmatprep.subr.bf16.mxu0 %v1542_v29  ;;  %v1203_v19 = vadd.f32 %v1736_v14, %v1202_v10 }
 0x341   : > { %v1204_v31 = vadd.f32 %v1738_v56, %v1203_v19 }
 0x342   : > { %1545 = vmatpush1.bf16.msra.mxu0 %v2962_v5 }
 0x343   : > { %1547 = vmatprep.subr.bf16.mxu0 %v1546_v16  ;;  %v1205_v12 = vadd.f32 %v1740_v15, %v1204_v31  ;;  %v268_v16 = vpop.permute.xlu1 %267  ;;  %v459_v31 = vld [vmem:[%s1954_s16 + $0x10] sm:$0xff] }
 0x344   : > { %v402_v45 = vadd.f32 %v2972_v8, %v268_v16 }
 0x345   : > { %v1206_v55 = vadd.f32 %v1742_v59, %v1205_v12  ;;  %v404_v59 = vadd.f32 %v2970_v9, %v268_v16 }
 0x346   : > { %1549 = vmatpush1.bf16.msra.mxu0 %v2963_v44 }
 0x347   : > { %1551 = vmatprep.subr.bf16.mxu0 %v1550_v34  ;;  %v1207_v43 = vadd.f32 %v1744_v47, %v1206_v55  ;;  %v2971_v47 = vld [vmem:[#allocation13_spill] sm:$0xff]  ;;  %v278_v34 = vpop.permute.xlu1 %277  ;;  %v460_v55 = vld [vmem:[%s1954_s16 + $0x18] sm:$0xff] }
 0x348   : > { %v414_v24 = vadd.f32 %v2976_v48, %v278_v34 }
 0x349   : > { %v1208_v40 = vadd.f32 %v1746_v36, %v1207_v43  ;;  %v2975_v36 = vld [vmem:[#allocation12_spill] sm:$0xff] }
 0x34a   : > { %1553 = vmatpush1.bf16.msra.mxu0 %v2964_v53 }
 0x34b   : > { %1555 = vmatprep.subr.bf16.mxu0 %v1554_v50  ;;  %v1209_v62 = vadd.f32 %v1748_v2, %v1208_v40  ;;  %v416_v2 = vadd.f32 %v2975_v36, %v278_v34  ;;  %v1181_v50 = vadd.f32 %v1180_v54, %v1179_v46 }
 0x34d   : > { %v1210_v14 = vadd.f32 %v1750_v38, %v1209_v62  ;;  %v1182_v28 = vrot.slane %v1181_v50, 2 }
 0x34e   : > { %1557 = vmatpush1.bf16.msra.mxu0 %v2965_v7 }
 0x34f   : > { %1559 = vmatprep.subr.bf16.mxu0 %v1558_v37  ;;  %v1211_v29 = vadd.f32 %v1752_v61, %v1210_v14  ;;  %v1183_v42 = vadd.f32 %v1182_v28, %v1181_v50 }
 0x351   : > { %v1212_v30 = vadd.f32 %v1754_v49, %v1211_v29  ;;  %v1184_v37 = vrot.slane %v1183_v42, 1  ;;  %v461_v29 = vld [vmem:[%s1954_s16 + $0x20] sm:$0xff] }
 0x352   : > { %1561 = vmatpush1.bf16.msra.mxu0 %v2966_v32 }
 0x353   : > { %1563 = vmatprep.subr.bf16.mxu0 %v1562_v27  ;;  %v1213_v56 = vadd.f32 %v1756_v11, %v1212_v30  ;;  %v1185_v11 = vadd.f32 %v1184_v37, %v1183_v42 }
 0x355   : > { %v1214_v26 = vadd.f32 %v1758_v21, %v1213_v56  ;;  %1763 = vrcp.f32 %v1185_v11  ;;  %v1325_v21 = vstv %s1316_s8  ;;  %v462_v56 = vld [vmem:[%s1954_s16 + $0x28] sm:$0xff] }
 0x356   : > { %1565 = vmatpush1.bf16.msra.mxu0 %v2967_v52 }
 0x357   : > { %1567 = vmatprep.subr.bf16.mxu0 %v1566_v18  ;;  %v1215_v15 = vadd.f32 %v1760_v23, %v1214_v26 }
 0x359   : > { %v1216_v35 = vadd.f32 %v1762_v13, %v1215_v15 }
 0x35a   : > { %1569 = vmatpush1.bf16.msra.mxu0 %v2968_v57 }
 0x35b   : > { %1571 = vmatprep.subr.bf16.mxu0 %v1570_v60  ;;  %v1217_v33 = vrot.slane %v1216_v35, 4 }
 0x35d   : > { %v1218_v38 = vadd.f32 %v1217_v33, %v1216_v35 }
 0x35e   : > { %1573 = vmatpush1.bf16.msra.mxu0 %v2969_v20  ;;  %v463_v20 = vld [vmem:[%s1954_s16 + $0x30] sm:$0xff]  ;;  %s1767_s16 = scalar_lea.vmem %s2760_s13, 1024 }
 0x35f   : > { %v1219_v61 = vrot.slane %v1218_v38, 2  ;;  %v1764_v6 = vpop.eup %1763  ;;  %p1768_p12 = scmp.ne.s32.totalorder %s2760_s13, %s1767_s16  ;;  %p1775_p2 = scmp.lt.s32.totalorder %s1773_s27, %s1767_s16 }
 0x361   : > { %1292 = vmatmul.mubr.f32.vlgmr.msra.gmra.mrb[16].mxu0 %v2971_v47  ;;  %v1220_v51 = vadd.f32 %v1219_v61, %v1218_v38  ;;  %p1769_p13 = pnand %p1768_p12, %p1920_p4  ;;  %p1776_p3 = por %p1775_p2, %p1774_p1 }
 0x362   : > { %1297 = vmatprep.mubr.f32.mxu0 %v404_v59 }
 0x363   : > { %v1221_v49 = vrot.slane %v1220_v51, 1  ;;  %p1770_p0 = pneg %p1769_p13 }
 0x365   : > { %1298 = vmatmul.mubr.f32.gmra.mrb[18].mxu0 %v402_v45  ;;  %v1222_v22 = vadd.f32 %v1221_v49, %v1220_v51  ;;  %p1777_p5 = pnand %p1776_p3, %p1770_p0 }
 0x366   : > { %1303 = vmatprep.mubr.f32.mxu0 %v410_v41 }
 0x367   : > { %1765 = vrcp.f32 %v1222_v22 }
 0x369   : > { %1304 = vmatmul.mubr.f32.gmra.mrb[20].mxu0 %v408_v4 }
 0x36a   : > { %1309 = vmatprep.mubr.f32.mxu0 %v416_v2 }
 0x36d   : > { %1310 = vmatmul.mubr.f32.gmra.mrb[22].mxu0 %v414_v24 }
 0x371   : > { %v1766_v63 = vpop.eup %1765 }
 0x434   : > { %v1293_v27 = vpop.f32.mrb[16].mxu0 }
 0x435   : > { %v1317_v23 = vmul.f32 %v1764_v6, %v1293_v27  ;;  %v1295_v46 = vpop.f32.mrb[17].mxu0 }
 0x436   : > { %v1318_v18 = vmul.f32 %v1766_v63, %v1295_v46 }
 0x437   : > { %v1326_v13 = vmul.f32 %v1325_v21, %v1317_v23 }
 0x438   : > { %v1327_v60 = vmul.f32 %v1325_v21, %v1318_v18  ;;  %v1299_v0 = vpop.f32.mrb[18].mxu0 }
 0x439   : > { %v1334_v10 = vadd.f32 %v1326_v13, %v457_v1  ;;  %v1319_v19 = vmul.f32 %v1764_v6, %v1299_v0  ;;  %v1301_v58 = vpop.f32.mrb[19].mxu0 }
 0x43a   : > { %v1335_v5 = vadd.f32 %v1327_v60, %v458_v3  ;;  %v1320_v12 = vmul.f32 %v1766_v63, %v1301_v58 }
 0x43b   : > { %1342 = vst [vmem:[%s2740_s11] sm:$0xff] %v1334_v10  ;;  %v1328_v44 = vmul.f32 %v1325_v21, %v1319_v19 }
 0x43c   : > { %1343 = vst [vmem:[%s2740_s11 + $0x8] sm:$0xff] %v1335_v5  ;;  %v1329_v43 = vmul.f32 %v1325_v21, %v1320_v12  ;;  %v1305_v53 = vpop.f32.mrb[20].mxu0 }
 0x43d   : > { %v1336_v40 = vadd.f32 %v1328_v44, %v459_v31  ;;  %v1321_v62 = vmul.f32 %v1764_v6, %v1305_v53  ;;  %v1307_v7 = vpop.f32.mrb[21].mxu0 }
 0x43e   : > { %v1337_v14 = vadd.f32 %v1329_v43, %v460_v55  ;;  %v1322_v32 = vmul.f32 %v1766_v63, %v1307_v7 }
 0x43f   : > { %1344 = vst [vmem:[%s2740_s11 + $0x10] sm:$0xff] %v1336_v40  ;;  %v1330_v30 = vmul.f32 %v1325_v21, %v1321_v62 }
 0x440   : > { %1345 = vst [vmem:[%s2740_s11 + $0x18] sm:$0xff] %v1337_v14  ;;  %v1331_v52 = vmul.f32 %v1325_v21, %v1322_v32  ;;  %v1311_v26 = vpop.f32.mrb[22].mxu0 }
 0x441   : > { %v1338_v15 = vadd.f32 %v1330_v30, %v461_v29  ;;  %v1323_v57 = vmul.f32 %v1764_v6, %v1311_v26  ;;  %v1313_v35 = vpop.f32.mrb[23].mxu0 }
 0x442   : > { %v1339_v16 = vadd.f32 %v1331_v52, %v462_v56  ;;  %v1324_v9 = vmul.f32 %v1766_v63, %v1313_v35 }
 0x443   : > { %1346 = vst [vmem:[%s2740_s11 + $0x20] sm:$0xff] %v1338_v15  ;;  %v1332_v59 = vmul.f32 %v1325_v21, %v1323_v57 }
 0x444   : > { %1347 = vst [vmem:[%s2740_s11 + $0x28] sm:$0xff] %v1339_v16  ;;  %v1333_v47 = vmul.f32 %v1325_v21, %v1324_v9 }
 0x445   : > { %v1340_v8 = vadd.f32 %v1332_v59, %v463_v20 }
 0x446   : > { %v1341_v45 = vadd.f32 %v1333_v47, %v464_v39 }
 0x447   : > { %1348 = vst [vmem:[%s2740_s11 + $0x30] sm:$0xff] %v1340_v8 }
 0x448   : > { %1349 = vst [vmem:[%s2740_s11 + $0x38] sm:$0xff] %v1341_v45 }
 0x449   : > { %1780 = shalt.err (!%p1777_p5)
}
 0x44a   : > { %s1781_s30 = scalar_lea.hbm %s2758_s0, 1024  ;;  %s1785_s7 = scalar_lea.hbm %s2816_s4, 2048 }
 0x44b   : > { %p1782_p6 = scmp.ne.s32.totalorder %s2758_s0, %s1781_s30  ;;  %p1786_p10 = scmp.lt.u32.totalorder %s2758_s0, %s2816_s4 }
 0x44c   : > { %p1787_p11 = scmp.lt.u32.totalorder %s1785_s7, %s1781_s30  ;;  %p1789_p13 = scmp.lt.u32.totalorder %s1781_s30, %s2758_s0 }
 0x44d   : > { %p1783_p7 = pnand %p1782_p6, %p1920_p4 }
 0x44e   : > { %p1788_p12 = por %p1787_p11, %p1786_p10 }
 0x44f   : > { %p1784_p9 = pneg %p1783_p7 }
 0x450   : > { %p1790_p0 = por %p1789_p13, %p1788_p12 }
 0x452   : > { %p1791_p1 = pnand %p1790_p0, %p1784_p9 }
 0x454   : > { %1794 = shalt.err (!%p1791_p1)
}
 0x455   : > { %s1850_s10 = smov 256   ;;  %s1851_s11 = smov 16  }
 0x456   : > { %1574 = dma.vmem_to_hbm [thread:$0]  (%p1920_p4), %s2760_s13, 1024, %s2758_s0, %s2766_s20, %s1850_s10, %s1850_s10, %s1851_s11  }
 0x457 PF: > { %p1580_p2 = scmp.ge.s32.totalorder %s1845_s22, 2  ;;  %s1381_s12 = sand.u32 1, %s1825_s17  }
 0x458   : > { %s1382_s14 = scalar_lea.sflag [#allocation5], %s1381_s12 }
 0x459   : > { %p1577_p3 = pnand %p1580_p2, %p1927_p8 }
 0x45b   : > { %1820 = dma.done.wait (!%p1577_p3), %s1382_s14, 1024  }
 0x45c   : > { %1822 = vsyncadd (!%p1577_p3), %s1382_s14, 4294966272  ;;  %s18_s22 = sadd.s32 1, %s1845_s22   ;;  %s2977_s17 = smov %s1829_s18 }
 0x45d   : > { %p15_p5 = scmp.ge.s32.totalorder %s18_s22, 4   ;;  %s2978_s18 = smov %s1833_s19 }
 0x45e   : > { %s2979_s19 = smov %s1933_s29  ;;  %s2980_s20 = smov %s1841_s21 }
 0x45f   : > { %s2981_s21 = smov %s2983_s24  ;;  %17 = sbr.rel (!%p15_p5) target bundleno = 6 (0x6), region = 77 }
 0x466   :  { %1387 = vsyncpa [#allocation5], 1 }
 0x467   :  { %1389 = vsyncpa [#allocation5 + $0x1], 1 }

</bundles_post_ra>
